<compile_context>
chip_gen: v7x
topology: tpu7x:2x2x1
jax: 0.10.0
libtpu: 0.0.40
codegen_flags: <defaults>
</compile_context>

<pallas_src>
import functools

import jax
import jax.numpy as jnp
from jax import lax
from jax.experimental import pallas as pl
from jax.experimental.pallas import tpu as pltpu


def _round_up(x, m):
    return (x + m - 1) // m * m


# --------------------------- Pallas kernels ---------------------------------

def _conv_gemm_stats_kernel(a_ref, w_ref, y_ref, psum_ref, psq_ref, acc_ref):
    """K-tiled im2col GEMM tile (TM,TK)@(TK,TN) with f32 VMEM accumulator.

    Epilogue (last K step) stores the conv output tile plus per-(M-tile,
    Cout-tile) partial channel sum / sum-of-squares for BatchNorm statistics,
    keeping the inner K loop MXU-only.
    """
    k = pl.program_id(2)

    @pl.when(k == 0)
    def _():
        acc_ref[...] = jnp.zeros_like(acc_ref)

    acc_ref[...] += jnp.dot(a_ref[...], w_ref[...],
                            preferred_element_type=jnp.float32)

    @pl.when(k == pl.num_programs(2) - 1)
    def _():
        acc = acc_ref[...]
        y_ref[...] = acc.astype(y_ref.dtype)
        psum_ref[...] = jnp.sum(acc, axis=0, keepdims=True)[None]
        psq_ref[...] = jnp.sum(acc * acc, axis=0, keepdims=True)[None]


def _bn_relu_kernel(y_ref, scale_ref, shift_ref, o_ref, *, use_relu):
    out = y_ref[...] * scale_ref[...] + shift_ref[...]
    if use_relu:
        out = jnp.maximum(out, 0.0)
    o_ref[...] = out.astype(o_ref.dtype)


# --------------------------- wrapper -----------------------------------------

def conv3d_bn(x, weight, gamma, beta, *, stride=1, padding=0, dilation=1,
              use_relu=True, eps=1e-5):
    """Forward of Conv3dBn.  x: (N, Cin, D, H, W), weight: (Cout, Cin, kd, kh, kw)."""
    N, Cin, D, H, W = x.shape
    Cout, Cin_w, kd, kh, kw = weight.shape
    assert Cin == Cin_w
    s, p, dil = stride, padding, dilation

    Do = (D + 2 * p - dil * (kd - 1) - 1) // s + 1
    Ho = (H + 2 * p - dil * (kh - 1) - 1) // s + 1
    Wo = (W + 2 * p - dil * (kw - 1) - 1) // s + 1

    KK = kd * kh * kw
    M = N * Do * Ho * Wo
    K = Cin * KK

    # --- tile geometry (128-aligned, well under the v5e/v7x scoped VMEM) -----
    TM = 512                                   # GEMM rows per tile
    TM2 = 1024                                 # BN/ReLU rows per tile (TM2 % TM == 0)
    TK = min(512, _round_up(K, 128))           # GEMM K tile
    TN = 128 if Cout <= 128 else 256           # Cout lane tile
    Mp = _round_up(M, TM2)
    KP = _round_up(K, TK)
    CP = _round_up(Cout, TN)
    n_m, n_n, n_k = Mp // TM, CP // TN, KP // TK

    # --- im2col glue (bf16 to halve the A-matrix HBM traffic) ----------------
    # Note: a fully implicit in-kernel im2col (per-tap DMA) would avoid
    # materializing the KK-times-larger A matrix; kept explicit here so the
    # kernel stays correct for arbitrary stride / dilation / padding.
    xb = x.astype(jnp.bfloat16)
    xpad = jnp.pad(xb, ((0, 0), (0, 0), (p, p), (p, p), (p, p)))
    cols = []
    for a in range(kd):
        for b in range(kh):
            for c in range(kw):
                sl = xpad[:, :,
                          a * dil: a * dil + (Do - 1) * s + 1: s,
                          b * dil: b * dil + (Ho - 1) * s + 1: s,
                          c * dil: c * dil + (Wo - 1) * s + 1: s]
                cols.append(sl)
    patches = jnp.stack(cols, axis=0)               # (KK, N, Cin, Do, Ho, Wo)
    patches = patches.transpose(1, 3, 4, 5, 2, 0)   # (N, Do, Ho, Wo, Cin, KK)
    patches = patches.reshape(M, K)
    a_mat = jnp.pad(patches, ((0, Mp - M), (0, KP - K)))          # bf16 (Mp, KP)

    wmat = weight.reshape(Cout, K).T.astype(jnp.bfloat16)         # (K, Cout)
    w_mat = jnp.pad(wmat, ((0, KP - K), (0, CP - Cout)))          # bf16 (KP, CP)

    # --- kernel 1: tiled GEMM + per-tile partial channel statistics ----------
    cost = pl.CostEstimate(
        flops=2 * Mp * KP * CP,
        transcendentals=0,
        bytes_accessed=Mp * KP * 2 + KP * CP * 2 + Mp * CP * 4)

    y_pad, psum, psq = pl.pallas_call(
        _conv_gemm_stats_kernel,
        out_shape=(jax.ShapeDtypeStruct((Mp, CP), jnp.float32),
                   jax.ShapeDtypeStruct((n_m, 1, CP), jnp.float32),
                   jax.ShapeDtypeStruct((n_m, 1, CP), jnp.float32)),
        grid_spec=pltpu.PrefetchScalarGridSpec(
            num_scalar_prefetch=0, grid=(n_m, n_n, n_k),
            in_specs=[pl.BlockSpec((TM, TK), lambda i, j, k: (i, k)),
                      pl.BlockSpec((TK, TN), lambda i, j, k: (k, j))],
            out_specs=(pl.BlockSpec((TM, TN), lambda i, j, k: (i, j)),
                       pl.BlockSpec((1, 1, TN), lambda i, j, k: (i, 0, j)),
                       pl.BlockSpec((1, 1, TN), lambda i, j, k: (i, 0, j))),
            scratch_shapes=[pltpu.VMEM((TM, TN), jnp.float32)]),
        compiler_params=pltpu.CompilerParams(
            dimension_semantics=("parallel", "parallel", "arbitrary")),
        cost_estimate=cost,
    )(a_mat, w_mat)

    # --- BatchNorm3d (training mode: batch stats, biased variance), f32 ------
    count = jnp.float32(M)                 # padded rows contribute exactly zero
    ch_sum = jnp.sum(psum, axis=0)[0, :Cout]
    ch_sq = jnp.sum(psq, axis=0)[0, :Cout]
    mean = ch_sum / count
    var = ch_sq / count - mean * mean      # f32; acceptable for activations
    inv_std = lax.rsqrt(var + eps)
    scale = gamma.astype(jnp.float32) * inv_std
    shift = beta.astype(jnp.float32) - mean * scale
    scale_p = jnp.pad(scale[None, :], ((0, 0), (0, CP - Cout)))
    shift_p = jnp.pad(shift[None, :], ((0, 0), (0, CP - Cout)))

    # --- kernel 2: fused normalize + ReLU (HBM-bandwidth bound), in place ----
    out_pad = pl.pallas_call(
        functools.partial(_bn_relu_kernel, use_relu=use_relu),
        out_shape=jax.ShapeDtypeStruct((Mp, CP), jnp.float32),
        grid_spec=pltpu.PrefetchScalarGridSpec(
            num_scalar_prefetch=0, grid=(Mp // TM2,),
            in_specs=[pl.BlockSpec((TM2, CP), lambda i: (i, 0)),
                      pl.BlockSpec((1, CP), lambda i: (0, 0)),
                      pl.BlockSpec((1, CP), lambda i: (0, 0))],
            out_specs=pl.BlockSpec((TM2, CP), lambda i: (i, 0))),
        compiler_params=pltpu.CompilerParams(
            dimension_semantics=("parallel",)),
        input_output_aliases={0: 0},
    )(y_pad, scale_p, shift_p)

    out = out_pad[:M, :Cout].reshape(N, Do, Ho, Wo, Cout)
    return out.transpose(0, 4, 1, 2, 3)  # -> NCDHW (module contract)


# --------------------------- demo / check ------------------------------------

if __name__ == "__main__":
    key = jax.random.PRNGKey(0)
    k1, k2 = jax.random.split(key)

    N, Cin, Cout = 2, 4, 8
    D = H = W = 8
    ksize, stride, padding, dilation = 3, 1, 1, 1
    eps = 1e-5

    x = jax.random.normal(k1, (N, Cin, D, H, W), jnp.float32)
    weight = 0.1 * jax.random.normal(k2, (Cout, Cin, ksize, ksize, ksize), jnp.float32)
    gamma = 1.0 + 0.1 * jnp.arange(Cout, dtype=jnp.float32)
    beta = 0.05 * jnp.arange(Cout, dtype=jnp.float32)

    fwd = jax.jit(functools.partial(
        conv3d_bn, stride=stride, padding=padding, dilation=dilation,
        use_relu=True, eps=eps))
    out = jax.block_until_ready(fwd(x, weight, gamma, beta))

    # Plain-JAX reference (Conv3d -> training-mode BN -> ReLU).  The kernel
    # feeds the MXU bf16 operands, so the reference conv uses bf16-rounded
    # inputs with f32 accumulation for an apples-to-apples comparison.
    xb = x.astype(jnp.bfloat16).astype(jnp.float32)
    wb = weight.astype(jnp.bfloat16).astype(jnp.float32)
    ref_conv = lax.conv_general_dilated(
        xb, wb, window_strides=(stride,) * 3,
        padding=[(padding, padding)] * 3, rhs_dilation=(dilation,) * 3,
        dimension_numbers=("NCDHW", "OIDHW", "NCDHW"),
        precision=lax.Precision.HIGHEST,
        preferred_element_type=jnp.float32)
    m = ref_conv.mean(axis=(0, 2, 3, 4), keepdims=True)
    v = ref_conv.var(axis=(0, 2, 3, 4), keepdims=True)
    ref = (ref_conv - m) / jnp.sqrt(v + eps)
    ref = ref * gamma[None, :, None, None, None] + beta[None, :, None, None, None]
    ref = jnp.maximum(ref, 0.0)

    assert out.shape == ref.shape, (out.shape, ref.shape)
    err = float(jnp.max(jnp.abs(out - ref)))
    assert err < 5e-3, err
    print("KERNEL_OK")
</pallas_src>

<mosaic_0001>
module attributes {stable_mosaic.version = 11 : i64} {
  func.func @_conv_gemm_stats_kernel(%arg0: i32, %arg1: i32, %arg2: i32, %arg3: memref<512x128xbf16, #tpu.memory_space<vmem>>, %arg4: memref<128x128xbf16, #tpu.memory_space<vmem>>, %arg5: memref<512x128xf32, #tpu.memory_space<vmem>>, %arg6: memref<1x1x128xf32, #tpu.memory_space<vmem>>, %arg7: memref<1x1x128xf32, #tpu.memory_space<vmem>>, %arg8: memref<512x128xf32, #tpu.memory_space<vmem>>) attributes {dimension_semantics = [#tpu.dimension_semantics<parallel>, #tpu.dimension_semantics<parallel>, #tpu.dimension_semantics<arbitrary>], iteration_bounds = array<i64: 2, 1, 1>, scalar_prefetch = 0 : i64, scratch_operands = 1 : i64, tpu.core_type = #tpu.core_type<tc>, window_params = [{transform_indices = @transform_0, window_bounds = array<i64: 512, 128>}, {transform_indices = @transform_1, window_bounds = array<i64: 128, 128>}, {transform_indices = @transform_2, window_bounds = array<i64: 512, 128>}, {transform_indices = @transform_3, window_bounds = array<i64: 1, 1, 128>}, {transform_indices = @transform_4, window_bounds = array<i64: 1, 1, 128>}]} {
    %c0_i32 = arith.constant 0 : i32
    %0 = arith.cmpi eq, %arg2, %c0_i32 : i32
    %1 = arith.extui %0 : i1 to i32
    %c0_i32_0 = arith.constant 0 : i32
    %2 = arith.cmpi ne, %1, %c0_i32_0 : i32
    scf.if %2 {
      %cst_10 = arith.constant 0.000000e+00 : f32
      %12 = vector.broadcast %cst_10 : f32 to vector<512x128xf32>
      %c0_11 = arith.constant 0 : index
      %c0_12 = arith.constant 0 : index
      %13 = vector.load %arg8[%c0_11, %c0_12] : memref<512x128xf32, #tpu.memory_space<vmem>>, vector<512x128xf32>
      tpu.vector_store %arg8[%c0_11, %c0_12], %12 {strides = array<i32>} : memref<512x128xf32, #tpu.memory_space<vmem>>, vector<512x128xf32>,
    } else {
    }
    %c0 = arith.constant 0 : index
    %c0_1 = arith.constant 0 : index
    %3 = vector.load %arg8[%c0, %c0_1] : memref<512x128xf32, #tpu.memory_space<vmem>>, vector<512x128xf32>
    %c0_2 = arith.constant 0 : index
    %c0_3 = arith.constant 0 : index
    %4 = vector.load %arg3[%c0_2, %c0_3] : memref<512x128xbf16, #tpu.memory_space<vmem>>, vector<512x128xbf16>
    %c0_4 = arith.constant 0 : index
    %c0_5 = arith.constant 0 : index
    %5 = vector.load %arg4[%c0_4, %c0_5] : memref<128x128xbf16, #tpu.memory_space<vmem>>, vector<128x128xbf16>
    %cst = arith.constant dense<0.000000e+00> : vector<512x128xf32>
    %6 = tpu.matmul %4, %5, %cst {dimension_numbers = #tpu.dot_dimension_numbers<[1], [0], [0], [1], [0, 0, 1, 1], [], []>} : vector<512x128xbf16>, vector<128x128xbf16>, vector<512x128xf32> -> vector<512x128xf32>
    %7 = arith.addf %3, %6 : vector<512x128xf32>
    %c0_6 = arith.constant 0 : index
    %c0_7 = arith.constant 0 : index
    %8 = vector.load %arg8[%c0_6, %c0_7] : memref<512x128xf32, #tpu.memory_space<vmem>>, vector<512x128xf32>
    tpu.vector_store %arg8[%c0_6, %c0_7], %7 {strides = array<i32>} : memref<512x128xf32, #tpu.memory_space<vmem>>, vector<512x128xf32>,
    %c0_i32_8 = arith.constant 0 : i32
    %9 = arith.cmpi eq, %arg2, %c0_i32_8 : i32
    %10 = arith.extui %9 : i1 to i32
    %c0_i32_9 = arith.constant 0 : i32
    %11 = arith.cmpi ne, %10, %c0_i32_9 : i32
    scf.if %11 {
      %c0_10 = arith.constant 0 : index
      %c0_11 = arith.constant 0 : index
      %12 = vector.load %arg8[%c0_10, %c0_11] : memref<512x128xf32, #tpu.memory_space<vmem>>, vector<512x128xf32>
      %c0_12 = arith.constant 0 : index
      %c0_13 = arith.constant 0 : index
      %13 = vector.load %arg5[%c0_12, %c0_13] : memref<512x128xf32, #tpu.memory_space<vmem>>, vector<512x128xf32>
      tpu.vector_store %arg5[%c0_12, %c0_13], %12 {strides = array<i32>} : memref<512x128xf32, #tpu.memory_space<vmem>>, vector<512x128xf32>,
      %cst_14 = arith.constant dense<0.000000e+00> : vector<128xf32>
      %14 = vector.multi_reduction <add>, %12, %cst_14 [0] : vector<512x128xf32> to vector<128xf32>
      %15 = vector.shape_cast %14 : vector<128xf32> to vector<1x128xf32>
      %16 = vector.shape_cast %15 : vector<1x128xf32> to vector<1x1x128xf32>
      %c0_15 = arith.constant 0 : index
      %c0_16 = arith.constant 0 : index
      %c0_17 = arith.constant 0 : index
      %17 = vector.load %arg6[%c0_15, %c0_16, %c0_17] : memref<1x1x128xf32, #tpu.memory_space<vmem>>, vector<1x1x128xf32>
      tpu.vector_store %arg6[%c0_15, %c0_16, %c0_17], %16 {strides = array<i32>} : memref<1x1x128xf32, #tpu.memory_space<vmem>>, vector<1x1x128xf32>,
      %18 = arith.mulf %12, %12 : vector<512x128xf32>
      %cst_18 = arith.constant dense<0.000000e+00> : vector<128xf32>
      %19 = vector.multi_reduction <add>, %18, %cst_18 [0] : vector<512x128xf32> to vector<128xf32>
      %20 = vector.shape_cast %19 : vector<128xf32> to vector<1x128xf32>
      %21 = vector.shape_cast %20 : vector<1x128xf32> to vector<1x1x128xf32>
      %c0_19 = arith.constant 0 : index
      %c0_20 = arith.constant 0 : index
      %c0_21 = arith.constant 0 : index
      %22 = vector.load %arg7[%c0_19, %c0_20, %c0_21] : memref<1x1x128xf32, #tpu.memory_space<vmem>>, vector<1x1x128xf32>
      tpu.vector_store %arg7[%c0_19, %c0_20, %c0_21], %21 {strides = array<i32>} : memref<1x1x128xf32, #tpu.memory_space<vmem>>, vector<1x1x128xf32>,
    } else {
    }
    return
  }
  func.func @transform_0(%arg0: i32, %arg1: i32, %arg2: i32) -> (i32, i32) {
    %c0_i32 = arith.constant 0 : i32
    return %arg0, %arg2 : i32, i32
  }
  func.func @transform_1(%arg0: i32, %arg1: i32, %arg2: i32) -> (i32, i32) {
    %c0_i32 = arith.constant 0 : i32
    return %arg2, %arg1 : i32, i32
  }
  func.func @transform_2(%arg0: i32, %arg1: i32, %arg2: i32) -> (i32, i32) {
    %c0_i32 = arith.constant 0 : i32
    return %arg0, %arg1 : i32, i32
  }
  func.func @transform_3(%arg0: i32, %arg1: i32, %arg2: i32) -> (i32, i32, i32) {
    %c0_i32 = arith.constant 0 : i32
    %c0_i32_0 = arith.constant 0 : i32
    return %arg0, %c0_i32, %arg1 : i32, i32, i32
  }
  func.func @transform_4(%arg0: i32, %arg1: i32, %arg2: i32) -> (i32, i32, i32) {
    %c0_i32 = arith.constant 0 : i32
    %c0_i32_0 = arith.constant 0 : i32
    return %arg0, %c0_i32, %arg1 : i32, i32, i32
  }
}

module attributes {stable_mosaic.version = 11 : i64} {
  func.func @_bn_relu_kernel(%arg0: i32, %arg1: memref<1024x128xf32, #tpu.memory_space<vmem>>, %arg2: memref<1x128xf32, #tpu.memory_space<vmem>>, %arg3: memref<1x128xf32, #tpu.memory_space<vmem>>, %arg4: memref<1024x128xf32, #tpu.memory_space<vmem>>) attributes {dimension_semantics = [#tpu.dimension_semantics<parallel>], iteration_bounds = array<i64: 1>, scalar_prefetch = 0 : i64, scratch_operands = 0 : i64, tpu.core_type = #tpu.core_type<tc>, window_params = [{transform_indices = @transform_0, window_bounds = array<i64: 1024, 128>}, {pipeline_mode = #tpu.pipeline_mode<synchronous>, transform_indices = @transform_1, window_bounds = array<i64: 1, 128>}, {pipeline_mode = #tpu.pipeline_mode<synchronous>, transform_indices = @transform_2, window_bounds = array<i64: 1, 128>}, {transform_indices = @transform_3, window_bounds = array<i64: 1024, 128>}]} {
    %c0 = arith.constant 0 : index
    %c0_0 = arith.constant 0 : index
    %0 = vector.load %arg1[%c0, %c0_0] : memref<1024x128xf32, #tpu.memory_space<vmem>>, vector<1024x128xf32>
    %c0_1 = arith.constant 0 : index
    %c0_2 = arith.constant 0 : index
    %1 = vector.load %arg2[%c0_1, %c0_2] : memref<1x128xf32, #tpu.memory_space<vmem>>, vector<1x128xf32>
    %2 = vector.broadcast %1 : vector<1x128xf32> to vector<1024x128xf32>
    %3 = arith.mulf %0, %2 : vector<1024x128xf32>
    %c0_3 = arith.constant 0 : index
    %c0_4 = arith.constant 0 : index
    %4 = vector.load %arg3[%c0_3, %c0_4] : memref<1x128xf32, #tpu.memory_space<vmem>>, vector<1x128xf32>
    %5 = vector.broadcast %4 : vector<1x128xf32> to vector<1024x128xf32>
    %6 = arith.addf %3, %5 : vector<1024x128xf32>
    %cst = arith.constant 0.000000e+00 : f32
    %7 = vector.broadcast %cst : f32 to vector<1024x128xf32>
    %8 = arith.maximumf %6, %7 : vector<1024x128xf32>
    %c0_5 = arith.constant 0 : index
    %c0_6 = arith.constant 0 : index
    %9 = vector.load %arg4[%c0_5, %c0_6] : memref<1024x128xf32, #tpu.memory_space<vmem>>, vector<1024x128xf32>
    tpu.vector_store %arg4[%c0_5, %c0_6], %8 {strides = array<i32>} : memref<1024x128xf32, #tpu.memory_space<vmem>>, vector<1024x128xf32>,
    return
  }
  func.func @transform_0(%arg0: i32) -> (i32, i32) {
    %c0_i32 = arith.constant 0 : i32
    %c0_i32_0 = arith.constant 0 : i32
    return %arg0, %c0_i32 : i32, i32
  }
  func.func @transform_1(%arg0: i32) -> (i32, i32) {
    %c0_i32 = arith.constant 0 : i32
    %c0_i32_0 = arith.constant 0 : i32
    %c0_i32_1 = arith.constant 0 : i32
    return %c0_i32, %c0_i32_0 : i32, i32
  }
  func.func @transform_2(%arg0: i32) -> (i32, i32) {
    %c0_i32 = arith.constant 0 : i32
    %c0_i32_0 = arith.constant 0 : i32
    %c0_i32_1 = arith.constant 0 : i32
    return %c0_i32, %c0_i32_0 : i32, i32
  }
  func.func @transform_3(%arg0: i32) -> (i32, i32) {
    %c0_i32 = arith.constant 0 : i32
    %c0_i32_0 = arith.constant 0 : i32
    return %arg0, %c0_i32 : i32, i32
  }
}

</mosaic_0001>

<bundles_post_ra>
// kernel: conv3d_bn.3
= control target key start
LH: loop header
LB: loop body
LE: loop exit
PB: predicated region body
PF: predicated region fallthrough
CT: control target
= control target key end

     0   :  { %s1740_s0 = inlined_call_operand.vmem [shape: f32[1024,128], index: 0, kind: input, shape index: {}, may-alias: {0,3}]   ;;  %s1741_s1 = inlined_call_operand.vmem [shape: f32[1,128], index: 1, kind: input, shape index: {}]   ;;  %s1742_s2 = inlined_call_operand.vmem [shape: f32[1,128], index: 2, kind: input, shape index: {}]   ;;  %s1743_s3 = inlined_call_operand.vmem [shape: f32[1024,128], index: 3, kind: output, shape index: {}, may-alias: {0,3}]  }
   0x1   :  { %v14_v0 = vld [vmem:[%s1740_s0] sm:$0xff]  ;;  %v15_v4 = vld [vmem:[%s1740_s0 + $0x8] sm:$0xff]  ;;  %v16_v5 = vld [vmem:[%s1740_s0 + $0x10] sm:$0xff] }
   0x2   :  { %v702_v1 = vld [vmem:[%s1741_s1] ss:$0 sm:$0xff]  ;;  %v17_v6 = vld [vmem:[%s1740_s0 + $0x18] sm:$0xff]  ;;  %v19_v11 = vld [vmem:[%s1740_s0 + $0x28] sm:$0xff] }
   0x3   :  { %v707_v2 = vld [vmem:[%s1742_s2] ss:$0 sm:$0xff]  ;;  %v149_v3 = vmul.f32 %v702_v1, %v14_v0  ;;  %v150_v7 = vmul.f32 %v702_v1, %v15_v4  ;;  %v151_v8 = vmul.f32 %v702_v1, %v16_v5  ;;  %v152_v9 = vmul.f32 %v702_v1, %v17_v6  ;;  %v20_v12 = vld [vmem:[%s1740_s0 + $0x30] sm:$0xff]  ;;  %v21_v17 = vld [vmem:[%s1740_s0 + $0x38] sm:$0xff] }
   0x4   :  { %v18_v10 = vld [vmem:[%s1740_s0 + $0x20] sm:$0xff]  ;;  %v154_v15 = vmul.f32 %v702_v1, %v19_v11  ;;  %v155_v16 = vmul.f32 %v702_v1, %v20_v12  ;;  %v156_v21 = vmul.f32 %v702_v1, %v21_v17  ;;  %v23_v27 = vld [vmem:[%s1740_s0 + $0x48] sm:$0xff]  ;;  %v24_v28 = vld [vmem:[%s1740_s0 + $0x50] sm:$0xff] }
   0x5   :  { %v284_v13 = vadd.f32 %v707_v2, %v149_v3  ;;  %v153_v14 = vmul.f32 %v702_v1, %v18_v10  ;;  %v285_v18 = vadd.f32 %v707_v2, %v150_v7  ;;  %v286_v19 = vadd.f32 %v707_v2, %v151_v8  ;;  %v22_v22 = vld [vmem:[%s1740_s0 + $0x40] sm:$0xff]  ;;  %v25_v29 = vld [vmem:[%s1740_s0 + $0x58] sm:$0xff]  ;;  %v27_v35 = vld [vmem:[%s1740_s0 + $0x68] sm:$0xff] }
   0x6   :  { %v287_v20 = vadd.f32 %v707_v2, %v152_v9  ;;  %v289_v25 = vadd.f32 %v707_v2, %v154_v15  ;;  %v290_v26 = vadd.f32 %v707_v2, %v155_v16  ;;  %v291_v33 = vadd.f32 %v707_v2, %v156_v21  ;;  %v26_v34 = vld [vmem:[%s1740_s0 + $0x60] sm:$0xff]  ;;  %v28_v36 = vld [vmem:[%s1740_s0 + $0x70] sm:$0xff] }
   0x7   :  { %v412_v23 = vmax.f32 %v284_v13, 0.0  ;;  %v288_v24 = vadd.f32 %v707_v2, %v153_v14  ;;  %v413_v30 = vmax.f32 %v285_v18, 0.0  ;;  %v414_v31 = vmax.f32 %v286_v19, 0.0 }
   0x8   :  { %v415_v32 = vmax.f32 %v287_v20, 0.0  ;;  %v417_v38 = vmax.f32 %v289_v25, 0.0  ;;  %v418_v39 = vmax.f32 %v290_v26, 0.0  ;;  %v157_v40 = vmul.f32 %v702_v1, %v22_v22 }
   0x9   :  { %540 = vst [vmem:[%s1743_s3] sm:$0xff] %v412_v23  ;;  %v416_v37 = vmax.f32 %v288_v24, 0.0  ;;  %v419_v42 = vmax.f32 %v291_v33, 0.0  ;;  %v158_v43 = vmul.f32 %v702_v1, %v23_v27  ;;  %v159_v44 = vmul.f32 %v702_v1, %v24_v28 }
   0xa   :  { %v160_v45 = vmul.f32 %v702_v1, %v25_v29  ;;  %v292_v46 = vadd.f32 %v707_v2, %v157_v40  ;;  %v161_v47 = vmul.f32 %v702_v1, %v26_v34  ;;  %v162_v48 = vmul.f32 %v702_v1, %v27_v35 }
   0xb   :  { %v163_v49 = vmul.f32 %v702_v1, %v28_v36  ;;  %v293_v50 = vadd.f32 %v707_v2, %v158_v43  ;;  %v294_v51 = vadd.f32 %v707_v2, %v159_v44 }
   0xc   :  { %v295_v52 = vadd.f32 %v707_v2, %v160_v45  ;;  %v420_v55 = vmax.f32 %v292_v46, 0.0  ;;  %v296_v56 = vadd.f32 %v707_v2, %v161_v47  ;;  %v297_v57 = vadd.f32 %v707_v2, %v162_v48 }
   0xd   :  { %v298_v58 = vadd.f32 %v707_v2, %v163_v49  ;;  %v421_v62 = vmax.f32 %v293_v50, 0.0  ;;  %v422_v63 = vmax.f32 %v294_v51, 0.0 }
   0xe   :  { %v423_v0 = vmax.f32 %v295_v52, 0.0  ;;  %v424_v7 = vmax.f32 %v296_v56, 0.0  ;;  %v425_v8 = vmax.f32 %v297_v57, 0.0 }
   0xf   :  { %v426_v9 = vmax.f32 %v298_v58, 0.0 }
  0x10   :  { %v29_v41 = vld [vmem:[%s1740_s0 + $0x78] sm:$0xff] }
  0x11   :  { %541 = vst [vmem:[%s1743_s3 + $0x8] sm:$0xff] %v413_v30  ;;  %542 = vst [vmem:[%s1743_s3 + $0x10] sm:$0xff] %v414_v31  ;;  %v164_v53 = vmul.f32 %v702_v1, %v29_v41 }
  0x12   :  { %543 = vst [vmem:[%s1743_s3 + $0x18] sm:$0xff] %v415_v32  ;;  %544 = vst [vmem:[%s1743_s3 + $0x20] sm:$0xff] %v416_v37 }
  0x13   :  { %545 = vst [vmem:[%s1743_s3 + $0x28] sm:$0xff] %v417_v38  ;;  %546 = vst [vmem:[%s1743_s3 + $0x30] sm:$0xff] %v418_v39  ;;  %v299_v3 = vadd.f32 %v707_v2, %v164_v53 }
  0x14   :  { %547 = vst [vmem:[%s1743_s3 + $0x38] sm:$0xff] %v419_v42 }
  0x15   :  { %v427_v12 = vmax.f32 %v299_v3, 0.0 }
  0x1b   :  { %v30_v54 = vld [vmem:[%s1740_s0 + $0x80] sm:$0xff]  ;;  %v31_v59 = vld [vmem:[%s1740_s0 + $0x88] sm:$0xff]  ;;  %v32_v60 = vld [vmem:[%s1740_s0 + $0x90] sm:$0xff] }
  0x1c   :  { %v33_v61 = vld [vmem:[%s1740_s0 + $0x98] sm:$0xff]  ;;  %v34_v4 = vld [vmem:[%s1740_s0 + $0xa0] sm:$0xff]  ;;  %v35_v5 = vld [vmem:[%s1740_s0 + $0xa8] sm:$0xff]  ;;  %v165_v10 = vmul.f32 %v702_v1, %v30_v54  ;;  %v166_v13 = vmul.f32 %v702_v1, %v31_v59  ;;  %v167_v14 = vmul.f32 %v702_v1, %v32_v60 }
  0x1d   :  { %v36_v6 = vld [vmem:[%s1740_s0 + $0xb0] sm:$0xff]  ;;  %v168_v15 = vmul.f32 %v702_v1, %v33_v61  ;;  %v169_v17 = vmul.f32 %v702_v1, %v34_v4  ;;  %v170_v18 = vmul.f32 %v702_v1, %v35_v5 }
  0x1e   :  { %548 = vst [vmem:[%s1743_s3 + $0x40] sm:$0xff] %v420_v55  ;;  %v300_v16 = vadd.f32 %v707_v2, %v165_v10  ;;  %v171_v19 = vmul.f32 %v702_v1, %v36_v6  ;;  %v301_v20 = vadd.f32 %v707_v2, %v166_v13  ;;  %v302_v21 = vadd.f32 %v707_v2, %v167_v14 }
  0x1f   :  { %v303_v22 = vadd.f32 %v707_v2, %v168_v15  ;;  %v304_v26 = vadd.f32 %v707_v2, %v169_v17  ;;  %v305_v27 = vadd.f32 %v707_v2, %v170_v18 }
  0x20   :  { %v428_v25 = vmax.f32 %v300_v16, 0.0  ;;  %v306_v28 = vadd.f32 %v707_v2, %v171_v19  ;;  %v429_v32 = vmax.f32 %v301_v20, 0.0  ;;  %v430_v33 = vmax.f32 %v302_v21, 0.0 }
  0x21   :  { %v431_v34 = vmax.f32 %v303_v22, 0.0  ;;  %v432_v39 = vmax.f32 %v304_v26, 0.0  ;;  %v433_v40 = vmax.f32 %v305_v27, 0.0 }
  0x22   :  { %v434_v41 = vmax.f32 %v306_v28, 0.0 }
  0x25   :  { %v37_v11 = vld [vmem:[%s1740_s0 + $0xb8] sm:$0xff] }
  0x26   :  { %549 = vst [vmem:[%s1743_s3 + $0x48] sm:$0xff] %v421_v62  ;;  %550 = vst [vmem:[%s1743_s3 + $0x50] sm:$0xff] %v422_v63  ;;  %v172_v23 = vmul.f32 %v702_v1, %v37_v11 }
  0x27   :  { %551 = vst [vmem:[%s1743_s3 + $0x58] sm:$0xff] %v423_v0  ;;  %552 = vst [vmem:[%s1743_s3 + $0x60] sm:$0xff] %v424_v7 }
  0x28   :  { %553 = vst [vmem:[%s1743_s3 + $0x68] sm:$0xff] %v425_v8  ;;  %554 = vst [vmem:[%s1743_s3 + $0x70] sm:$0xff] %v426_v9  ;;  %v307_v35 = vadd.f32 %v707_v2, %v172_v23 }
  0x29   :  { %555 = vst [vmem:[%s1743_s3 + $0x78] sm:$0xff] %v427_v12 }
  0x2a   :  { %v435_v44 = vmax.f32 %v307_v35, 0.0 }
  0x30   :  { %v38_v24 = vld [vmem:[%s1740_s0 + $0xc0] sm:$0xff]  ;;  %v39_v29 = vld [vmem:[%s1740_s0 + $0xc8] sm:$0xff]  ;;  %v40_v30 = vld [vmem:[%s1740_s0 + $0xd0] sm:$0xff] }
  0x31   :  { %v41_v31 = vld [vmem:[%s1740_s0 + $0xd8] sm:$0xff]  ;;  %v42_v36 = vld [vmem:[%s1740_s0 + $0xe0] sm:$0xff]  ;;  %v43_v37 = vld [vmem:[%s1740_s0 + $0xe8] sm:$0xff]  ;;  %v173_v42 = vmul.f32 %v702_v1, %v38_v24  ;;  %v174_v45 = vmul.f32 %v702_v1, %v39_v29  ;;  %v175_v46 = vmul.f32 %v702_v1, %v40_v30 }
  0x32   :  { %v44_v38 = vld [vmem:[%s1740_s0 + $0xf0] sm:$0xff]  ;;  %v176_v47 = vmul.f32 %v702_v1, %v41_v31  ;;  %v177_v49 = vmul.f32 %v702_v1, %v42_v36  ;;  %v178_v50 = vmul.f32 %v702_v1, %v43_v37 }
  0x33   :  { %556 = vst [vmem:[%s1743_s3 + $0x80] sm:$0xff] %v428_v25  ;;  %v308_v48 = vadd.f32 %v707_v2, %v173_v42  ;;  %v179_v51 = vmul.f32 %v702_v1, %v44_v38  ;;  %v309_v52 = vadd.f32 %v707_v2, %v174_v45  ;;  %v310_v53 = vadd.f32 %v707_v2, %v175_v46 }
  0x34   :  { %v311_v54 = vadd.f32 %v707_v2, %v176_v47  ;;  %v312_v58 = vadd.f32 %v707_v2, %v177_v49  ;;  %v313_v59 = vadd.f32 %v707_v2, %v178_v50 }
  0x35   :  { %v436_v57 = vmax.f32 %v308_v48, 0.0  ;;  %v314_v60 = vadd.f32 %v707_v2, %v179_v51  ;;  %v437_v0 = vmax.f32 %v309_v52, 0.0  ;;  %v438_v3 = vmax.f32 %v310_v53, 0.0 }
  0x36   :  { %v439_v4 = vmax.f32 %v311_v54, 0.0  ;;  %v440_v9 = vmax.f32 %v312_v58, 0.0  ;;  %v441_v10 = vmax.f32 %v313_v59, 0.0 }
  0x37   :  { %v442_v11 = vmax.f32 %v314_v60, 0.0 }
  0x3a   :  { %v45_v43 = vld [vmem:[%s1740_s0 + $0xf8] sm:$0xff] }
  0x3b   :  { %557 = vst [vmem:[%s1743_s3 + $0x88] sm:$0xff] %v429_v32  ;;  %558 = vst [vmem:[%s1743_s3 + $0x90] sm:$0xff] %v430_v33  ;;  %v180_v55 = vmul.f32 %v702_v1, %v45_v43 }
  0x3c   :  { %559 = vst [vmem:[%s1743_s3 + $0x98] sm:$0xff] %v431_v34  ;;  %560 = vst [vmem:[%s1743_s3 + $0xa0] sm:$0xff] %v432_v39 }
  0x3d   :  { %561 = vst [vmem:[%s1743_s3 + $0xa8] sm:$0xff] %v433_v40  ;;  %562 = vst [vmem:[%s1743_s3 + $0xb0] sm:$0xff] %v434_v41  ;;  %v315_v5 = vadd.f32 %v707_v2, %v180_v55 }
  0x3e   :  { %563 = vst [vmem:[%s1743_s3 + $0xb8] sm:$0xff] %v435_v44 }
  0x3f   :  { %v443_v14 = vmax.f32 %v315_v5, 0.0 }
  0x45   :  { %v46_v56 = vld [vmem:[%s1740_s0 + $0x100] sm:$0xff]  ;;  %v47_v61 = vld [vmem:[%s1740_s0 + $0x108] sm:$0xff]  ;;  %v48_v62 = vld [vmem:[%s1740_s0 + $0x110] sm:$0xff] }
  0x46   :  { %v49_v63 = vld [vmem:[%s1740_s0 + $0x118] sm:$0xff]  ;;  %v50_v6 = vld [vmem:[%s1740_s0 + $0x120] sm:$0xff]  ;;  %v51_v7 = vld [vmem:[%s1740_s0 + $0x128] sm:$0xff]  ;;  %v181_v12 = vmul.f32 %v702_v1, %v46_v56  ;;  %v182_v15 = vmul.f32 %v702_v1, %v47_v61  ;;  %v183_v16 = vmul.f32 %v702_v1, %v48_v62 }
  0x47   :  { %v52_v8 = vld [vmem:[%s1740_s0 + $0x130] sm:$0xff]  ;;  %v184_v17 = vmul.f32 %v702_v1, %v49_v63  ;;  %v185_v19 = vmul.f32 %v702_v1, %v50_v6  ;;  %v186_v20 = vmul.f32 %v702_v1, %v51_v7 }
  0x48   :  { %564 = vst [vmem:[%s1743_s3 + $0xc0] sm:$0xff] %v436_v57  ;;  %v316_v18 = vadd.f32 %v707_v2, %v181_v12  ;;  %v187_v21 = vmul.f32 %v702_v1, %v52_v8  ;;  %v317_v22 = vadd.f32 %v707_v2, %v182_v15  ;;  %v318_v23 = vadd.f32 %v707_v2, %v183_v16 }
  0x49   :  { %v319_v24 = vadd.f32 %v707_v2, %v184_v17  ;;  %v320_v28 = vadd.f32 %v707_v2, %v185_v19  ;;  %v321_v29 = vadd.f32 %v707_v2, %v186_v20 }
  0x4a   :  { %v444_v27 = vmax.f32 %v316_v18, 0.0  ;;  %v322_v30 = vadd.f32 %v707_v2, %v187_v21  ;;  %v445_v34 = vmax.f32 %v317_v22, 0.0  ;;  %v446_v35 = vmax.f32 %v318_v23, 0.0 }
  0x4b   :  { %v447_v36 = vmax.f32 %v319_v24, 0.0  ;;  %v448_v41 = vmax.f32 %v320_v28, 0.0  ;;  %v449_v42 = vmax.f32 %v321_v29, 0.0 }
  0x4c   :  { %v450_v43 = vmax.f32 %v322_v30, 0.0 }
  0x4f   :  { %v53_v13 = vld [vmem:[%s1740_s0 + $0x138] sm:$0xff] }
  0x50   :  { %565 = vst [vmem:[%s1743_s3 + $0xc8] sm:$0xff] %v437_v0  ;;  %566 = vst [vmem:[%s1743_s3 + $0xd0] sm:$0xff] %v438_v3  ;;  %v188_v25 = vmul.f32 %v702_v1, %v53_v13 }
  0x51   :  { %567 = vst [vmem:[%s1743_s3 + $0xd8] sm:$0xff] %v439_v4  ;;  %568 = vst [vmem:[%s1743_s3 + $0xe0] sm:$0xff] %v440_v9 }
  0x52   :  { %569 = vst [vmem:[%s1743_s3 + $0xe8] sm:$0xff] %v441_v10  ;;  %570 = vst [vmem:[%s1743_s3 + $0xf0] sm:$0xff] %v442_v11  ;;  %v323_v37 = vadd.f32 %v707_v2, %v188_v25 }
  0x53   :  { %571 = vst [vmem:[%s1743_s3 + $0xf8] sm:$0xff] %v443_v14 }
  0x54   :  { %v451_v46 = vmax.f32 %v323_v37, 0.0 }
  0x5a   :  { %v54_v26 = vld [vmem:[%s1740_s0 + $0x140] sm:$0xff]  ;;  %v55_v31 = vld [vmem:[%s1740_s0 + $0x148] sm:$0xff]  ;;  %v56_v32 = vld [vmem:[%s1740_s0 + $0x150] sm:$0xff] }
  0x5b   :  { %v57_v33 = vld [vmem:[%s1740_s0 + $0x158] sm:$0xff]  ;;  %v58_v38 = vld [vmem:[%s1740_s0 + $0x160] sm:$0xff]  ;;  %v59_v39 = vld [vmem:[%s1740_s0 + $0x168] sm:$0xff]  ;;  %v189_v44 = vmul.f32 %v702_v1, %v54_v26  ;;  %v190_v47 = vmul.f32 %v702_v1, %v55_v31  ;;  %v191_v48 = vmul.f32 %v702_v1, %v56_v32 }
  0x5c   :  { %v60_v40 = vld [vmem:[%s1740_s0 + $0x170] sm:$0xff]  ;;  %v192_v49 = vmul.f32 %v702_v1, %v57_v33  ;;  %v193_v51 = vmul.f32 %v702_v1, %v58_v38  ;;  %v194_v52 = vmul.f32 %v702_v1, %v59_v39 }
  0x5d   :  { %572 = vst [vmem:[%s1743_s3 + $0x100] sm:$0xff] %v444_v27  ;;  %v324_v50 = vadd.f32 %v707_v2, %v189_v44  ;;  %v195_v53 = vmul.f32 %v702_v1, %v60_v40  ;;  %v325_v54 = vadd.f32 %v707_v2, %v190_v47  ;;  %v326_v55 = vadd.f32 %v707_v2, %v191_v48 }
  0x5e   :  { %v327_v56 = vadd.f32 %v707_v2, %v192_v49  ;;  %v328_v60 = vadd.f32 %v707_v2, %v193_v51  ;;  %v329_v61 = vadd.f32 %v707_v2, %v194_v52 }
  0x5f   :  { %v452_v59 = vmax.f32 %v324_v50, 0.0  ;;  %v330_v62 = vadd.f32 %v707_v2, %v195_v53  ;;  %v453_v4 = vmax.f32 %v325_v54, 0.0  ;;  %v454_v5 = vmax.f32 %v326_v55, 0.0 }
  0x60   :  { %v455_v6 = vmax.f32 %v327_v56, 0.0  ;;  %v456_v11 = vmax.f32 %v328_v60, 0.0  ;;  %v457_v12 = vmax.f32 %v329_v61, 0.0 }
  0x61   :  { %v458_v13 = vmax.f32 %v330_v62, 0.0 }
  0x64   :  { %v61_v45 = vld [vmem:[%s1740_s0 + $0x178] sm:$0xff] }
  0x65   :  { %573 = vst [vmem:[%s1743_s3 + $0x108] sm:$0xff] %v445_v34  ;;  %574 = vst [vmem:[%s1743_s3 + $0x110] sm:$0xff] %v446_v35  ;;  %v196_v57 = vmul.f32 %v702_v1, %v61_v45 }
  0x66   :  { %575 = vst [vmem:[%s1743_s3 + $0x118] sm:$0xff] %v447_v36  ;;  %576 = vst [vmem:[%s1743_s3 + $0x120] sm:$0xff] %v448_v41 }
  0x67   :  { %577 = vst [vmem:[%s1743_s3 + $0x128] sm:$0xff] %v449_v42  ;;  %578 = vst [vmem:[%s1743_s3 + $0x130] sm:$0xff] %v450_v43  ;;  %v331_v7 = vadd.f32 %v707_v2, %v196_v57 }
  0x68   :  { %579 = vst [vmem:[%s1743_s3 + $0x138] sm:$0xff] %v451_v46 }
  0x69   :  { %v459_v16 = vmax.f32 %v331_v7, 0.0 }
  0x6f   :  { %v62_v58 = vld [vmem:[%s1740_s0 + $0x180] sm:$0xff]  ;;  %v63_v63 = vld [vmem:[%s1740_s0 + $0x188] sm:$0xff]  ;;  %v64_v0 = vld [vmem:[%s1740_s0 + $0x190] sm:$0xff] }
  0x70   :  { %v65_v3 = vld [vmem:[%s1740_s0 + $0x198] sm:$0xff]  ;;  %v66_v8 = vld [vmem:[%s1740_s0 + $0x1a0] sm:$0xff]  ;;  %v67_v9 = vld [vmem:[%s1740_s0 + $0x1a8] sm:$0xff]  ;;  %v197_v14 = vmul.f32 %v702_v1, %v62_v58  ;;  %v198_v17 = vmul.f32 %v702_v1, %v63_v63  ;;  %v199_v18 = vmul.f32 %v702_v1, %v64_v0 }
  0x71   :  { %v68_v10 = vld [vmem:[%s1740_s0 + $0x1b0] sm:$0xff]  ;;  %v200_v19 = vmul.f32 %v702_v1, %v65_v3  ;;  %v201_v21 = vmul.f32 %v702_v1, %v66_v8  ;;  %v202_v22 = vmul.f32 %v702_v1, %v67_v9 }
  0x72   :  { %580 = vst [vmem:[%s1743_s3 + $0x140] sm:$0xff] %v452_v59  ;;  %v332_v20 = vadd.f32 %v707_v2, %v197_v14  ;;  %v203_v23 = vmul.f32 %v702_v1, %v68_v10  ;;  %v333_v24 = vadd.f32 %v707_v2, %v198_v17  ;;  %v334_v25 = vadd.f32 %v707_v2, %v199_v18 }
  0x73   :  { %v335_v26 = vadd.f32 %v707_v2, %v200_v19  ;;  %v336_v30 = vadd.f32 %v707_v2, %v201_v21  ;;  %v337_v31 = vadd.f32 %v707_v2, %v202_v22 }
  0x74   :  { %v460_v29 = vmax.f32 %v332_v20, 0.0  ;;  %v338_v32 = vadd.f32 %v707_v2, %v203_v23  ;;  %v461_v36 = vmax.f32 %v333_v24, 0.0  ;;  %v462_v37 = vmax.f32 %v334_v25, 0.0 }
  0x75   :  { %v463_v38 = vmax.f32 %v335_v26, 0.0  ;;  %v464_v43 = vmax.f32 %v336_v30, 0.0  ;;  %v465_v44 = vmax.f32 %v337_v31, 0.0 }
  0x76   :  { %v466_v45 = vmax.f32 %v338_v32, 0.0 }
  0x79   :  { %v69_v15 = vld [vmem:[%s1740_s0 + $0x1b8] sm:$0xff] }
  0x7a   :  { %581 = vst [vmem:[%s1743_s3 + $0x148] sm:$0xff] %v453_v4  ;;  %582 = vst [vmem:[%s1743_s3 + $0x150] sm:$0xff] %v454_v5  ;;  %v204_v27 = vmul.f32 %v702_v1, %v69_v15 }
  0x7b   :  { %583 = vst [vmem:[%s1743_s3 + $0x158] sm:$0xff] %v455_v6  ;;  %584 = vst [vmem:[%s1743_s3 + $0x160] sm:$0xff] %v456_v11 }
  0x7c   :  { %585 = vst [vmem:[%s1743_s3 + $0x168] sm:$0xff] %v457_v12  ;;  %586 = vst [vmem:[%s1743_s3 + $0x170] sm:$0xff] %v458_v13  ;;  %v339_v39 = vadd.f32 %v707_v2, %v204_v27 }
  0x7d   :  { %587 = vst [vmem:[%s1743_s3 + $0x178] sm:$0xff] %v459_v16 }
  0x7e   :  { %v467_v48 = vmax.f32 %v339_v39, 0.0 }
  0x84   :  { %v70_v28 = vld [vmem:[%s1740_s0 + $0x1c0] sm:$0xff]  ;;  %v71_v33 = vld [vmem:[%s1740_s0 + $0x1c8] sm:$0xff]  ;;  %v72_v34 = vld [vmem:[%s1740_s0 + $0x1d0] sm:$0xff] }
  0x85   :  { %v73_v35 = vld [vmem:[%s1740_s0 + $0x1d8] sm:$0xff]  ;;  %v74_v40 = vld [vmem:[%s1740_s0 + $0x1e0] sm:$0xff]  ;;  %v75_v41 = vld [vmem:[%s1740_s0 + $0x1e8] sm:$0xff]  ;;  %v205_v46 = vmul.f32 %v702_v1, %v70_v28  ;;  %v206_v49 = vmul.f32 %v702_v1, %v71_v33  ;;  %v207_v50 = vmul.f32 %v702_v1, %v72_v34 }
  0x86   :  { %v76_v42 = vld [vmem:[%s1740_s0 + $0x1f0] sm:$0xff]  ;;  %v208_v51 = vmul.f32 %v702_v1, %v73_v35  ;;  %v209_v53 = vmul.f32 %v702_v1, %v74_v40  ;;  %v210_v54 = vmul.f32 %v702_v1, %v75_v41 }
  0x87   :  { %588 = vst [vmem:[%s1743_s3 + $0x180] sm:$0xff] %v460_v29  ;;  %v340_v52 = vadd.f32 %v707_v2, %v205_v46  ;;  %v211_v55 = vmul.f32 %v702_v1, %v76_v42  ;;  %v341_v56 = vadd.f32 %v707_v2, %v206_v49  ;;  %v342_v57 = vadd.f32 %v707_v2, %v207_v50 }
  0x88   :  { %v343_v58 = vadd.f32 %v707_v2, %v208_v51  ;;  %v344_v62 = vadd.f32 %v707_v2, %v209_v53  ;;  %v345_v63 = vadd.f32 %v707_v2, %v210_v54 }
  0x89   :  { %v468_v61 = vmax.f32 %v340_v52, 0.0  ;;  %v346_v0 = vadd.f32 %v707_v2, %v211_v55  ;;  %v469_v6 = vmax.f32 %v341_v56, 0.0  ;;  %v470_v7 = vmax.f32 %v342_v57, 0.0 }
  0x8a   :  { %v471_v8 = vmax.f32 %v343_v58, 0.0  ;;  %v472_v13 = vmax.f32 %v344_v62, 0.0  ;;  %v473_v14 = vmax.f32 %v345_v63, 0.0 }
  0x8b   :  { %v474_v15 = vmax.f32 %v346_v0, 0.0 }
  0x8e   :  { %v77_v47 = vld [vmem:[%s1740_s0 + $0x1f8] sm:$0xff] }
  0x8f   :  { %589 = vst [vmem:[%s1743_s3 + $0x188] sm:$0xff] %v461_v36  ;;  %590 = vst [vmem:[%s1743_s3 + $0x190] sm:$0xff] %v462_v37  ;;  %v212_v59 = vmul.f32 %v702_v1, %v77_v47 }
  0x90   :  { %591 = vst [vmem:[%s1743_s3 + $0x198] sm:$0xff] %v463_v38  ;;  %592 = vst [vmem:[%s1743_s3 + $0x1a0] sm:$0xff] %v464_v43 }
  0x91   :  { %593 = vst [vmem:[%s1743_s3 + $0x1a8] sm:$0xff] %v465_v44  ;;  %594 = vst [vmem:[%s1743_s3 + $0x1b0] sm:$0xff] %v466_v45  ;;  %v347_v9 = vadd.f32 %v707_v2, %v212_v59 }
  0x92   :  { %595 = vst [vmem:[%s1743_s3 + $0x1b8] sm:$0xff] %v467_v48 }
  0x93   :  { %v475_v18 = vmax.f32 %v347_v9, 0.0 }
  0x99   :  { %v78_v60 = vld [vmem:[%s1740_s0 + $0x200] sm:$0xff]  ;;  %v79_v3 = vld [vmem:[%s1740_s0 + $0x208] sm:$0xff]  ;;  %v80_v4 = vld [vmem:[%s1740_s0 + $0x210] sm:$0xff] }
  0x9a   :  { %v81_v5 = vld [vmem:[%s1740_s0 + $0x218] sm:$0xff]  ;;  %v82_v10 = vld [vmem:[%s1740_s0 + $0x220] sm:$0xff]  ;;  %v83_v11 = vld [vmem:[%s1740_s0 + $0x228] sm:$0xff]  ;;  %v213_v16 = vmul.f32 %v702_v1, %v78_v60  ;;  %v214_v19 = vmul.f32 %v702_v1, %v79_v3  ;;  %v215_v20 = vmul.f32 %v702_v1, %v80_v4 }
  0x9b   :  { %v84_v12 = vld [vmem:[%s1740_s0 + $0x230] sm:$0xff]  ;;  %v216_v21 = vmul.f32 %v702_v1, %v81_v5  ;;  %v217_v23 = vmul.f32 %v702_v1, %v82_v10  ;;  %v218_v24 = vmul.f32 %v702_v1, %v83_v11 }
  0x9c   :  { %596 = vst [vmem:[%s1743_s3 + $0x1c0] sm:$0xff] %v468_v61  ;;  %v348_v22 = vadd.f32 %v707_v2, %v213_v16  ;;  %v219_v25 = vmul.f32 %v702_v1, %v84_v12  ;;  %v349_v26 = vadd.f32 %v707_v2, %v214_v19  ;;  %v350_v27 = vadd.f32 %v707_v2, %v215_v20 }
  0x9d   :  { %v351_v28 = vadd.f32 %v707_v2, %v216_v21  ;;  %v352_v32 = vadd.f32 %v707_v2, %v217_v23  ;;  %v353_v33 = vadd.f32 %v707_v2, %v218_v24 }
  0x9e   :  { %v476_v31 = vmax.f32 %v348_v22, 0.0  ;;  %v354_v34 = vadd.f32 %v707_v2, %v219_v25  ;;  %v477_v38 = vmax.f32 %v349_v26, 0.0  ;;  %v478_v39 = vmax.f32 %v350_v27, 0.0 }
  0x9f   :  { %v479_v40 = vmax.f32 %v351_v28, 0.0  ;;  %v480_v45 = vmax.f32 %v352_v32, 0.0  ;;  %v481_v46 = vmax.f32 %v353_v33, 0.0 }
  0xa0   :  { %v482_v47 = vmax.f32 %v354_v34, 0.0 }
  0xa3   :  { %v85_v17 = vld [vmem:[%s1740_s0 + $0x238] sm:$0xff] }
  0xa4   :  { %597 = vst [vmem:[%s1743_s3 + $0x1c8] sm:$0xff] %v469_v6  ;;  %598 = vst [vmem:[%s1743_s3 + $0x1d0] sm:$0xff] %v470_v7  ;;  %v220_v29 = vmul.f32 %v702_v1, %v85_v17 }
  0xa5   :  { %599 = vst [vmem:[%s1743_s3 + $0x1d8] sm:$0xff] %v471_v8  ;;  %600 = vst [vmem:[%s1743_s3 + $0x1e0] sm:$0xff] %v472_v13 }
  0xa6   :  { %601 = vst [vmem:[%s1743_s3 + $0x1e8] sm:$0xff] %v473_v14  ;;  %602 = vst [vmem:[%s1743_s3 + $0x1f0] sm:$0xff] %v474_v15  ;;  %v355_v41 = vadd.f32 %v707_v2, %v220_v29 }
  0xa7   :  { %603 = vst [vmem:[%s1743_s3 + $0x1f8] sm:$0xff] %v475_v18 }
  0xa8   :  { %v483_v50 = vmax.f32 %v355_v41, 0.0 }
  0xae   :  { %v86_v30 = vld [vmem:[%s1740_s0 + $0x240] sm:$0xff]  ;;  %v87_v35 = vld [vmem:[%s1740_s0 + $0x248] sm:$0xff]  ;;  %v88_v36 = vld [vmem:[%s1740_s0 + $0x250] sm:$0xff] }
  0xaf   :  { %v89_v37 = vld [vmem:[%s1740_s0 + $0x258] sm:$0xff]  ;;  %v90_v42 = vld [vmem:[%s1740_s0 + $0x260] sm:$0xff]  ;;  %v91_v43 = vld [vmem:[%s1740_s0 + $0x268] sm:$0xff]  ;;  %v221_v48 = vmul.f32 %v702_v1, %v86_v30  ;;  %v222_v51 = vmul.f32 %v702_v1, %v87_v35  ;;  %v223_v52 = vmul.f32 %v702_v1, %v88_v36 }
  0xb0   :  { %v92_v44 = vld [vmem:[%s1740_s0 + $0x270] sm:$0xff]  ;;  %v224_v53 = vmul.f32 %v702_v1, %v89_v37  ;;  %v225_v55 = vmul.f32 %v702_v1, %v90_v42  ;;  %v226_v56 = vmul.f32 %v702_v1, %v91_v43 }
  0xb1   :  { %604 = vst [vmem:[%s1743_s3 + $0x200] sm:$0xff] %v476_v31  ;;  %v356_v54 = vadd.f32 %v707_v2, %v221_v48  ;;  %v227_v57 = vmul.f32 %v702_v1, %v92_v44  ;;  %v357_v58 = vadd.f32 %v707_v2, %v222_v51  ;;  %v358_v59 = vadd.f32 %v707_v2, %v223_v52 }
  0xb2   :  { %v359_v60 = vadd.f32 %v707_v2, %v224_v53  ;;  %v360_v0 = vadd.f32 %v707_v2, %v225_v55  ;;  %v361_v3 = vadd.f32 %v707_v2, %v226_v56 }
  0xb3   :  { %v484_v63 = vmax.f32 %v356_v54, 0.0  ;;  %v362_v4 = vadd.f32 %v707_v2, %v227_v57  ;;  %v485_v8 = vmax.f32 %v357_v58, 0.0  ;;  %v486_v9 = vmax.f32 %v358_v59, 0.0 }
  0xb4   :  { %v487_v10 = vmax.f32 %v359_v60, 0.0  ;;  %v488_v15 = vmax.f32 %v360_v0, 0.0  ;;  %v489_v16 = vmax.f32 %v361_v3, 0.0 }
  0xb5   :  { %v490_v17 = vmax.f32 %v362_v4, 0.0 }
  0xb8   :  { %v93_v49 = vld [vmem:[%s1740_s0 + $0x278] sm:$0xff] }
  0xb9   :  { %605 = vst [vmem:[%s1743_s3 + $0x208] sm:$0xff] %v477_v38  ;;  %606 = vst [vmem:[%s1743_s3 + $0x210] sm:$0xff] %v478_v39  ;;  %v228_v61 = vmul.f32 %v702_v1, %v93_v49 }
  0xba   :  { %607 = vst [vmem:[%s1743_s3 + $0x218] sm:$0xff] %v479_v40  ;;  %608 = vst [vmem:[%s1743_s3 + $0x220] sm:$0xff] %v480_v45 }
  0xbb   :  { %609 = vst [vmem:[%s1743_s3 + $0x228] sm:$0xff] %v481_v46  ;;  %610 = vst [vmem:[%s1743_s3 + $0x230] sm:$0xff] %v482_v47  ;;  %v363_v11 = vadd.f32 %v707_v2, %v228_v61 }
  0xbc   :  { %611 = vst [vmem:[%s1743_s3 + $0x238] sm:$0xff] %v483_v50 }
  0xbd   :  { %v491_v20 = vmax.f32 %v363_v11, 0.0 }
  0xc3   :  { %v94_v62 = vld [vmem:[%s1740_s0 + $0x280] sm:$0xff]  ;;  %v95_v5 = vld [vmem:[%s1740_s0 + $0x288] sm:$0xff]  ;;  %v96_v6 = vld [vmem:[%s1740_s0 + $0x290] sm:$0xff] }
  0xc4   :  { %v97_v7 = vld [vmem:[%s1740_s0 + $0x298] sm:$0xff]  ;;  %v98_v12 = vld [vmem:[%s1740_s0 + $0x2a0] sm:$0xff]  ;;  %v99_v13 = vld [vmem:[%s1740_s0 + $0x2a8] sm:$0xff]  ;;  %v229_v18 = vmul.f32 %v702_v1, %v94_v62  ;;  %v230_v21 = vmul.f32 %v702_v1, %v95_v5  ;;  %v231_v22 = vmul.f32 %v702_v1, %v96_v6 }
  0xc5   :  { %v100_v14 = vld [vmem:[%s1740_s0 + $0x2b0] sm:$0xff]  ;;  %v232_v23 = vmul.f32 %v702_v1, %v97_v7  ;;  %v233_v25 = vmul.f32 %v702_v1, %v98_v12  ;;  %v234_v26 = vmul.f32 %v702_v1, %v99_v13 }
  0xc6   :  { %612 = vst [vmem:[%s1743_s3 + $0x240] sm:$0xff] %v484_v63  ;;  %v364_v24 = vadd.f32 %v707_v2, %v229_v18  ;;  %v235_v27 = vmul.f32 %v702_v1, %v100_v14  ;;  %v365_v28 = vadd.f32 %v707_v2, %v230_v21  ;;  %v366_v29 = vadd.f32 %v707_v2, %v231_v22 }
  0xc7   :  { %v367_v30 = vadd.f32 %v707_v2, %v232_v23  ;;  %v368_v34 = vadd.f32 %v707_v2, %v233_v25  ;;  %v369_v35 = vadd.f32 %v707_v2, %v234_v26 }
  0xc8   :  { %v492_v33 = vmax.f32 %v364_v24, 0.0  ;;  %v370_v36 = vadd.f32 %v707_v2, %v235_v27  ;;  %v493_v40 = vmax.f32 %v365_v28, 0.0  ;;  %v494_v41 = vmax.f32 %v366_v29, 0.0 }
  0xc9   :  { %v495_v42 = vmax.f32 %v367_v30, 0.0  ;;  %v496_v47 = vmax.f32 %v368_v34, 0.0  ;;  %v497_v48 = vmax.f32 %v369_v35, 0.0 }
  0xca   :  { %v498_v49 = vmax.f32 %v370_v36, 0.0 }
  0xcd   :  { %v101_v19 = vld [vmem:[%s1740_s0 + $0x2b8] sm:$0xff] }
  0xce   :  { %613 = vst [vmem:[%s1743_s3 + $0x248] sm:$0xff] %v485_v8  ;;  %614 = vst [vmem:[%s1743_s3 + $0x250] sm:$0xff] %v486_v9  ;;  %v236_v31 = vmul.f32 %v702_v1, %v101_v19 }
  0xcf   :  { %615 = vst [vmem:[%s1743_s3 + $0x258] sm:$0xff] %v487_v10  ;;  %616 = vst [vmem:[%s1743_s3 + $0x260] sm:$0xff] %v488_v15 }
  0xd0   :  { %617 = vst [vmem:[%s1743_s3 + $0x268] sm:$0xff] %v489_v16  ;;  %618 = vst [vmem:[%s1743_s3 + $0x270] sm:$0xff] %v490_v17  ;;  %v371_v43 = vadd.f32 %v707_v2, %v236_v31 }
  0xd1   :  { %619 = vst [vmem:[%s1743_s3 + $0x278] sm:$0xff] %v491_v20 }
  0xd2   :  { %v499_v52 = vmax.f32 %v371_v43, 0.0 }
  0xd8   :  { %v102_v32 = vld [vmem:[%s1740_s0 + $0x2c0] sm:$0xff]  ;;  %v103_v37 = vld [vmem:[%s1740_s0 + $0x2c8] sm:$0xff]  ;;  %v104_v38 = vld [vmem:[%s1740_s0 + $0x2d0] sm:$0xff] }
  0xd9   :  { %v105_v39 = vld [vmem:[%s1740_s0 + $0x2d8] sm:$0xff]  ;;  %v106_v44 = vld [vmem:[%s1740_s0 + $0x2e0] sm:$0xff]  ;;  %v107_v45 = vld [vmem:[%s1740_s0 + $0x2e8] sm:$0xff]  ;;  %v237_v50 = vmul.f32 %v702_v1, %v102_v32  ;;  %v238_v53 = vmul.f32 %v702_v1, %v103_v37  ;;  %v239_v54 = vmul.f32 %v702_v1, %v104_v38 }
  0xda   :  { %v108_v46 = vld [vmem:[%s1740_s0 + $0x2f0] sm:$0xff]  ;;  %v240_v55 = vmul.f32 %v702_v1, %v105_v39  ;;  %v241_v57 = vmul.f32 %v702_v1, %v106_v44  ;;  %v242_v58 = vmul.f32 %v702_v1, %v107_v45  ;;  %v1528_v44 = vld [vmem:[%s1742_s2] ss:$0 sm:$0xff] }
  0xdb   :  { %620 = vst [vmem:[%s1743_s3 + $0x280] sm:$0xff] %v492_v33  ;;  %v372_v56 = vadd.f32 %v707_v2, %v237_v50  ;;  %v243_v59 = vmul.f32 %v702_v1, %v108_v46  ;;  %v373_v60 = vadd.f32 %v707_v2, %v238_v53  ;;  %v374_v61 = vadd.f32 %v707_v2, %v239_v54 }
  0xdc   :  { %v375_v62 = vadd.f32 %v707_v2, %v240_v55  ;;  %v376_v4 = vadd.f32 %v707_v2, %v241_v57  ;;  %v377_v5 = vadd.f32 %v707_v2, %v242_v58 }
  0xdd   :  { %v500_v3 = vmax.f32 %v372_v56, 0.0  ;;  %v378_v6 = vadd.f32 %v707_v2, %v243_v59  ;;  %v501_v10 = vmax.f32 %v373_v60, 0.0  ;;  %v502_v11 = vmax.f32 %v374_v61, 0.0 }
  0xde   :  { %v503_v12 = vmax.f32 %v375_v62, 0.0  ;;  %v504_v17 = vmax.f32 %v376_v4, 0.0  ;;  %v505_v18 = vmax.f32 %v377_v5, 0.0 }
  0xdf   :  { %v506_v19 = vmax.f32 %v378_v6, 0.0 }
  0xe2   :  { %v109_v51 = vld [vmem:[%s1740_s0 + $0x2f8] sm:$0xff] }
  0xe3   :  { %621 = vst [vmem:[%s1743_s3 + $0x288] sm:$0xff] %v493_v40  ;;  %622 = vst [vmem:[%s1743_s3 + $0x290] sm:$0xff] %v494_v41  ;;  %v244_v63 = vmul.f32 %v702_v1, %v109_v51  ;;  %v1546_v51 = vld [vmem:[%s1741_s1] ss:$0 sm:$0xff] }
  0xe4   :  { %623 = vst [vmem:[%s1743_s3 + $0x298] sm:$0xff] %v495_v42  ;;  %624 = vst [vmem:[%s1743_s3 + $0x2a0] sm:$0xff] %v496_v47 }
  0xe5   :  { %625 = vst [vmem:[%s1743_s3 + $0x2a8] sm:$0xff] %v497_v48  ;;  %626 = vst [vmem:[%s1743_s3 + $0x2b0] sm:$0xff] %v498_v49  ;;  %v379_v13 = vadd.f32 %v707_v2, %v244_v63 }
  0xe6   :  { %627 = vst [vmem:[%s1743_s3 + $0x2b8] sm:$0xff] %v499_v52 }
  0xe7   :  { %v507_v22 = vmax.f32 %v379_v13, 0.0 }
  0xed   :  { %v110_v0 = vld [vmem:[%s1740_s0 + $0x300] sm:$0xff]  ;;  %v111_v7 = vld [vmem:[%s1740_s0 + $0x308] sm:$0xff]  ;;  %v112_v8 = vld [vmem:[%s1740_s0 + $0x310] sm:$0xff] }
  0xee   :  { %v113_v9 = vld [vmem:[%s1740_s0 + $0x318] sm:$0xff]  ;;  %v114_v14 = vld [vmem:[%s1740_s0 + $0x320] sm:$0xff]  ;;  %v115_v15 = vld [vmem:[%s1740_s0 + $0x328] sm:$0xff]  ;;  %v245_v20 = vmul.f32 %v702_v1, %v110_v0  ;;  %v246_v23 = vmul.f32 %v702_v1, %v111_v7  ;;  %v247_v24 = vmul.f32 %v702_v1, %v112_v8 }
  0xef   :  { %v116_v16 = vld [vmem:[%s1740_s0 + $0x330] sm:$0xff]  ;;  %v248_v25 = vmul.f32 %v702_v1, %v113_v9  ;;  %v249_v27 = vmul.f32 %v702_v1, %v114_v14  ;;  %v250_v28 = vmul.f32 %v702_v1, %v115_v15 }
  0xf0   :  { %628 = vst [vmem:[%s1743_s3 + $0x2c0] sm:$0xff] %v500_v3  ;;  %v380_v26 = vadd.f32 %v707_v2, %v245_v20  ;;  %v251_v29 = vmul.f32 %v702_v1, %v116_v16  ;;  %v381_v30 = vadd.f32 %v707_v2, %v246_v23  ;;  %v382_v31 = vadd.f32 %v707_v2, %v247_v24 }
  0xf1   :  { %v383_v32 = vadd.f32 %v707_v2, %v248_v25  ;;  %v384_v36 = vadd.f32 %v707_v2, %v249_v27  ;;  %v385_v37 = vadd.f32 %v707_v2, %v250_v28 }
  0xf2   :  { %v508_v35 = vmax.f32 %v380_v26, 0.0  ;;  %v386_v38 = vadd.f32 %v707_v2, %v251_v29  ;;  %v509_v41 = vmax.f32 %v381_v30, 0.0  ;;  %v510_v42 = vmax.f32 %v382_v31, 0.0 }
  0xf3   :  { %v511_v43 = vmax.f32 %v383_v32, 0.0  ;;  %v512_v48 = vmax.f32 %v384_v36, 0.0  ;;  %v513_v49 = vmax.f32 %v385_v37, 0.0 }
  0xf4   :  { %v514_v50 = vmax.f32 %v386_v38, 0.0 }
  0xf7   :  { %v117_v21 = vld [vmem:[%s1740_s0 + $0x338] sm:$0xff] }
  0xf8   :  { %629 = vst [vmem:[%s1743_s3 + $0x2c8] sm:$0xff] %v501_v10  ;;  %630 = vst [vmem:[%s1743_s3 + $0x2d0] sm:$0xff] %v502_v11  ;;  %v252_v33 = vmul.f32 %v702_v1, %v117_v21 }
  0xf9   :  { %631 = vst [vmem:[%s1743_s3 + $0x2d8] sm:$0xff] %v503_v12  ;;  %632 = vst [vmem:[%s1743_s3 + $0x2e0] sm:$0xff] %v504_v17 }
  0xfa   :  { %633 = vst [vmem:[%s1743_s3 + $0x2e8] sm:$0xff] %v505_v18  ;;  %634 = vst [vmem:[%s1743_s3 + $0x2f0] sm:$0xff] %v506_v19  ;;  %v387_v2 = vadd.f32 %v1528_v44, %v252_v33 }
  0xfb   :  { %635 = vst [vmem:[%s1743_s3 + $0x2f8] sm:$0xff] %v507_v22 }
  0xfc   :  { %v515_v54 = vmax.f32 %v387_v2, 0.0 }
 0x102   :  { %v118_v34 = vld [vmem:[%s1740_s0 + $0x340] sm:$0xff]  ;;  %v119_v39 = vld [vmem:[%s1740_s0 + $0x348] sm:$0xff]  ;;  %v120_v40 = vld [vmem:[%s1740_s0 + $0x350] sm:$0xff] }
 0x103   :  { %v121_v1 = vld [vmem:[%s1740_s0 + $0x358] sm:$0xff]  ;;  %v122_v45 = vld [vmem:[%s1740_s0 + $0x360] sm:$0xff]  ;;  %v123_v46 = vld [vmem:[%s1740_s0 + $0x368] sm:$0xff]  ;;  %v253_v52 = vmul.f32 %v1546_v51, %v118_v34  ;;  %v254_v55 = vmul.f32 %v1546_v51, %v119_v39  ;;  %v255_v56 = vmul.f32 %v1546_v51, %v120_v40 }
 0x104   :  { %v124_v47 = vld [vmem:[%s1740_s0 + $0x370] sm:$0xff]  ;;  %v256_v57 = vmul.f32 %v1546_v51, %v121_v1  ;;  %v257_v59 = vmul.f32 %v1546_v51, %v122_v45  ;;  %v258_v60 = vmul.f32 %v1546_v51, %v123_v46 }
 0x105   :  { %636 = vst [vmem:[%s1743_s3 + $0x300] sm:$0xff] %v508_v35  ;;  %v388_v58 = vadd.f32 %v1528_v44, %v253_v52  ;;  %v259_v61 = vmul.f32 %v1546_v51, %v124_v47  ;;  %v389_v62 = vadd.f32 %v1528_v44, %v254_v55  ;;  %v390_v63 = vadd.f32 %v1528_v44, %v255_v56 }
 0x106   :  { %v391_v0 = vadd.f32 %v1528_v44, %v256_v57  ;;  %v392_v6 = vadd.f32 %v1528_v44, %v257_v59  ;;  %v393_v7 = vadd.f32 %v1528_v44, %v258_v60 }
 0x107   :  { %v516_v5 = vmax.f32 %v388_v58, 0.0  ;;  %v394_v8 = vadd.f32 %v1528_v44, %v259_v61  ;;  %v517_v12 = vmax.f32 %v389_v62, 0.0  ;;  %v518_v13 = vmax.f32 %v390_v63, 0.0 }
 0x108   :  { %v519_v14 = vmax.f32 %v391_v0, 0.0  ;;  %v520_v19 = vmax.f32 %v392_v6, 0.0  ;;  %v521_v20 = vmax.f32 %v393_v7, 0.0 }
 0x109   :  { %v522_v21 = vmax.f32 %v394_v8, 0.0 }
 0x10c   :  { %v125_v53 = vld [vmem:[%s1740_s0 + $0x378] sm:$0xff] }
 0x10d   :  { %637 = vst [vmem:[%s1743_s3 + $0x308] sm:$0xff] %v509_v41  ;;  %638 = vst [vmem:[%s1743_s3 + $0x310] sm:$0xff] %v510_v42  ;;  %v260_v3 = vmul.f32 %v1546_v51, %v125_v53 }
 0x10e   :  { %639 = vst [vmem:[%s1743_s3 + $0x318] sm:$0xff] %v511_v43  ;;  %640 = vst [vmem:[%s1743_s3 + $0x320] sm:$0xff] %v512_v48 }
 0x10f   :  { %641 = vst [vmem:[%s1743_s3 + $0x328] sm:$0xff] %v513_v49  ;;  %642 = vst [vmem:[%s1743_s3 + $0x330] sm:$0xff] %v514_v50  ;;  %v395_v15 = vadd.f32 %v1528_v44, %v260_v3 }
 0x110   :  { %643 = vst [vmem:[%s1743_s3 + $0x338] sm:$0xff] %v515_v54 }
 0x111   :  { %v523_v24 = vmax.f32 %v395_v15, 0.0 }
 0x117   :  { %v126_v4 = vld [vmem:[%s1740_s0 + $0x380] sm:$0xff]  ;;  %v127_v9 = vld [vmem:[%s1740_s0 + $0x388] sm:$0xff]  ;;  %v128_v10 = vld [vmem:[%s1740_s0 + $0x390] sm:$0xff] }
 0x118   :  { %v129_v11 = vld [vmem:[%s1740_s0 + $0x398] sm:$0xff]  ;;  %v130_v16 = vld [vmem:[%s1740_s0 + $0x3a0] sm:$0xff]  ;;  %v131_v17 = vld [vmem:[%s1740_s0 + $0x3a8] sm:$0xff]  ;;  %v261_v22 = vmul.f32 %v1546_v51, %v126_v4  ;;  %v262_v25 = vmul.f32 %v1546_v51, %v127_v9  ;;  %v263_v26 = vmul.f32 %v1546_v51, %v128_v10 }
 0x119   :  { %v132_v18 = vld [vmem:[%s1740_s0 + $0x3b0] sm:$0xff]  ;;  %v264_v27 = vmul.f32 %v1546_v51, %v129_v11  ;;  %v265_v29 = vmul.f32 %v1546_v51, %v130_v16  ;;  %v266_v30 = vmul.f32 %v1546_v51, %v131_v17 }
 0x11a   :  { %644 = vst [vmem:[%s1743_s3 + $0x340] sm:$0xff] %v516_v5  ;;  %v396_v28 = vadd.f32 %v1528_v44, %v261_v22  ;;  %v267_v31 = vmul.f32 %v1546_v51, %v132_v18  ;;  %v397_v32 = vadd.f32 %v1528_v44, %v262_v25  ;;  %v398_v33 = vadd.f32 %v1528_v44, %v263_v26 }
 0x11b   :  { %v399_v34 = vadd.f32 %v1528_v44, %v264_v27  ;;  %v400_v38 = vadd.f32 %v1528_v44, %v265_v29  ;;  %v401_v39 = vadd.f32 %v1528_v44, %v266_v30 }
 0x11c   :  { %v524_v37 = vmax.f32 %v396_v28, 0.0  ;;  %v402_v40 = vadd.f32 %v1528_v44, %v267_v31  ;;  %v525_v43 = vmax.f32 %v397_v32, 0.0  ;;  %v526_v2 = vmax.f32 %v398_v33, 0.0 }
 0x11d   :  { %v527_v45 = vmax.f32 %v399_v34, 0.0  ;;  %v528_v50 = vmax.f32 %v400_v38, 0.0  ;;  %v529_v52 = vmax.f32 %v401_v39, 0.0 }
 0x11e   :  { %v530_v53 = vmax.f32 %v402_v40, 0.0 }
 0x121   :  { %v133_v23 = vld [vmem:[%s1740_s0 + $0x3b8] sm:$0xff] }
 0x122   :  { %645 = vst [vmem:[%s1743_s3 + $0x348] sm:$0xff] %v517_v12  ;;  %646 = vst [vmem:[%s1743_s3 + $0x350] sm:$0xff] %v518_v13  ;;  %v268_v35 = vmul.f32 %v1546_v51, %v133_v23 }
 0x123   :  { %647 = vst [vmem:[%s1743_s3 + $0x358] sm:$0xff] %v519_v14  ;;  %648 = vst [vmem:[%s1743_s3 + $0x360] sm:$0xff] %v520_v19 }
 0x124   :  { %649 = vst [vmem:[%s1743_s3 + $0x368] sm:$0xff] %v521_v20  ;;  %650 = vst [vmem:[%s1743_s3 + $0x370] sm:$0xff] %v522_v21  ;;  %v403_v46 = vadd.f32 %v1528_v44, %v268_v35 }
 0x125   :  { %651 = vst [vmem:[%s1743_s3 + $0x378] sm:$0xff] %v523_v24 }
 0x126   :  { %v531_v56 = vmax.f32 %v403_v46, 0.0 }
 0x12c   :  { %v134_v36 = vld [vmem:[%s1740_s0 + $0x3c0] sm:$0xff]  ;;  %v135_v1 = vld [vmem:[%s1740_s0 + $0x3c8] sm:$0xff]  ;;  %v136_v41 = vld [vmem:[%s1740_s0 + $0x3d0] sm:$0xff] }
 0x12d   :  { %v137_v42 = vld [vmem:[%s1740_s0 + $0x3d8] sm:$0xff]  ;;  %v138_v47 = vld [vmem:[%s1740_s0 + $0x3e0] sm:$0xff]  ;;  %v139_v48 = vld [vmem:[%s1740_s0 + $0x3e8] sm:$0xff]  ;;  %v269_v54 = vmul.f32 %v1546_v51, %v134_v36  ;;  %v270_v57 = vmul.f32 %v1546_v51, %v135_v1  ;;  %v271_v58 = vmul.f32 %v1546_v51, %v136_v41 }
 0x12e   :  { %v140_v49 = vld [vmem:[%s1740_s0 + $0x3f0] sm:$0xff]  ;;  %v272_v59 = vmul.f32 %v1546_v51, %v137_v42  ;;  %v273_v61 = vmul.f32 %v1546_v51, %v138_v47  ;;  %v274_v62 = vmul.f32 %v1546_v51, %v139_v48 }
 0x12f   :  { %652 = vst [vmem:[%s1743_s3 + $0x380] sm:$0xff] %v524_v37  ;;  %v404_v60 = vadd.f32 %v1528_v44, %v269_v54  ;;  %v275_v63 = vmul.f32 %v1546_v51, %v140_v49  ;;  %v405_v0 = vadd.f32 %v1528_v44, %v270_v57  ;;  %v406_v3 = vadd.f32 %v1528_v44, %v271_v58 }
 0x130   :  { %v407_v4 = vadd.f32 %v1528_v44, %v272_v59  ;;  %v408_v7 = vadd.f32 %v1528_v44, %v273_v61  ;;  %v409_v8 = vadd.f32 %v1528_v44, %v274_v62 }
 0x131   :  { %v532_v6 = vmax.f32 %v404_v60, 0.0  ;;  %v410_v9 = vadd.f32 %v1528_v44, %v275_v63  ;;  %v533_v10 = vmax.f32 %v405_v0, 0.0  ;;  %v534_v11 = vmax.f32 %v406_v3, 0.0 }
 0x132   :  { %v535_v12 = vmax.f32 %v407_v4, 0.0  ;;  %v536_v14 = vmax.f32 %v408_v7, 0.0  ;;  %v537_v15 = vmax.f32 %v409_v8, 0.0 }
 0x133   :  { %v538_v16 = vmax.f32 %v410_v9, 0.0 }
 0x136   :  { %v141_v55 = vld [vmem:[%s1740_s0 + $0x3f8] sm:$0xff] }
 0x137   :  { %653 = vst [vmem:[%s1743_s3 + $0x388] sm:$0xff] %v525_v43  ;;  %654 = vst [vmem:[%s1743_s3 + $0x390] sm:$0xff] %v526_v2  ;;  %v276_v5 = vmul.f32 %v1546_v51, %v141_v55 }
 0x138   :  { %655 = vst [vmem:[%s1743_s3 + $0x398] sm:$0xff] %v527_v45  ;;  %656 = vst [vmem:[%s1743_s3 + $0x3a0] sm:$0xff] %v528_v50 }
 0x139   :  { %657 = vst [vmem:[%s1743_s3 + $0x3a8] sm:$0xff] %v529_v52  ;;  %658 = vst [vmem:[%s1743_s3 + $0x3b0] sm:$0xff] %v530_v53  ;;  %v411_v13 = vadd.f32 %v1528_v44, %v276_v5 }
 0x13a   :  { %659 = vst [vmem:[%s1743_s3 + $0x3b8] sm:$0xff] %v531_v56  ;;  %660 = vst [vmem:[%s1743_s3 + $0x3c0] sm:$0xff] %v532_v6 }
 0x13b   :  { %661 = vst [vmem:[%s1743_s3 + $0x3c8] sm:$0xff] %v533_v10  ;;  %662 = vst [vmem:[%s1743_s3 + $0x3d0] sm:$0xff] %v534_v11  ;;  %v539_v44 = vmax.f32 %v411_v13, 0.0 }
 0x13c   :  { %663 = vst [vmem:[%s1743_s3 + $0x3d8] sm:$0xff] %v535_v12  ;;  %664 = vst [vmem:[%s1743_s3 + $0x3e0] sm:$0xff] %v536_v14 }
 0x13d   :  { %665 = vst [vmem:[%s1743_s3 + $0x3e8] sm:$0xff] %v537_v15  ;;  %666 = vst [vmem:[%s1743_s3 + $0x3f0] sm:$0xff] %v538_v16 }
 0x13e   :  { %667 = vst [vmem:[%s1743_s3 + $0x3f8] sm:$0xff] %v539_v44 }

// kernel: conv3d_bn.2
= control target key start
LH: loop header
LB: loop body
LE: loop exit
PB: predicated region body
PF: predicated region fallthrough
CT: control target
= control target key end

     0   :  { %s1980_s15 = smov 0   ;;  %s1982_s16 = smov 0   ;;  %s2344_s0 = inlined_call_operand.vmem [shape: bf16[1024,128], index: 0, kind: input, shape index: {}]   ;;  %s2345_s1 = inlined_call_operand.vmem [shape: bf16[128,128], index: 1, kind: input, shape index: {}]   ;;  %s2346_s2 = inlined_call_operand.vmem [shape: f32[1024,128], index: 2, kind: output, shape index: {0}]   ;;  %s2347_s3 = inlined_call_operand.vmem [shape: f32[2,1,128], index: 3, kind: output, shape index: {1}]   ;;  %s2348_s4 = inlined_call_operand.vmem [shape: f32[2,1,128], index: 4, kind: output, shape index: {2}]  }
   0x1   :  { %s1984_s17 = smov 0  }
   0x2 LB: > { %s34_s18 = sadd.s32 1, %s1949_s16  ;;  %p1684_p0 = scmp.ge.s32.totalorder %s1953_s17, 1  ;;  %s1953_s17 = sphi %s1984_s17, %s15_s17   ;;  %s1949_s16 = sphi %s1982_s16, %s2350_s16   ;;  %s1945_s15 = sphi %s1980_s15, %s2349_s15  }
   0x3   : > { %p36_p1 = scmp.ge.s32.totalorder %s34_s18, 2  ;;  %p214_p2 = scmp.lt.s32.totalorder %s1953_s17, 3 }
   0x5   : > { %s2352_s18 = smov (%p36_p1, %s34_s18), 0  ;;  %p215_p3 = pnand %p1684_p0, %p214_p2 }
   0x6   : > { %v1891_v0 = vld [vmem:[%s2345_s1] sm:$0xff] (!%p215_p3)   ;;  %s1685_s21 = sshll.u32 (!%p215_p3), %s1945_s15, 6  ;;  %v1892_v1 = vld [vmem:[%s2345_s1 + $0x8] sm:$0xff] (!%p215_p3)   ;;  %v1893_v2 = vld [vmem:[%s2345_s1 + $0x10] sm:$0xff] (!%p215_p3)   ;;  %p293_p5 = scmp.lt.s32.totalorder (!%p215_p3), %s1945_s15, 1 }
   0x7   : > { %218 = sbr.rel (%p215_p3) target bundleno = 395 (0x18b), region = 28  ;;  %p267_p4 = scmp.lt.s32.totalorder (!%p215_p3), %s1685_s21, 127  ;;  %1771 = vmatprep.subr.bf16.mxu0 (!%p215_p3), %v1891_v0  ;;  %1851 = vmatprep.subr.bf16.mxu1 (!%p215_p3), %v1891_v0  ;;  %v1894_v3 = vld [vmem:[%s2345_s1 + $0x18] sm:$0xff] (!%p215_p3)   ;;  %v1895_v5 = vld [vmem:[%s2345_s1 + $0x20] sm:$0xff] (!%p215_p3)   ;;  %v1896_v6 = vld [vmem:[%s2345_s1 + $0x28] sm:$0xff] (!%p215_p3)  }
   0x8   : > { %1772 = vmatpush3.bf16.msra.mxu0 (!%p215_p3), %v1891_v0  ;;  %1859 = vmatpush3.bf16.msra.mxu1 (!%p215_p3), %v1891_v0  ;;  %v1897_v7 = vld [vmem:[%s2345_s1 + $0x30] sm:$0xff] (!%p215_p3)   ;;  %v1898_v8 = vld [vmem:[%s2345_s1 + $0x38] sm:$0xff] (!%p215_p3)  }
   0x9   : > { %1773 = vmatprep.subr.bf16.mxu0 (!%p215_p3), %v1892_v1  ;;  %1852 = vmatprep.subr.bf16.mxu1 (!%p215_p3), %v1892_v1 }
   0xc   : > { %1774 = vmatpush3.bf16.msra.mxu0 (!%p215_p3), %v1892_v1  ;;  %1860 = vmatpush3.bf16.msra.mxu1 (!%p215_p3), %v1892_v1 }
   0xd   : > { %1775 = vmatprep.subr.bf16.mxu0 (!%p215_p3), %v1893_v2  ;;  %1853 = vmatprep.subr.bf16.mxu1 (!%p215_p3), %v1893_v2 }
   0xe   : > { %s2354_s21 = smov (!%p267_p4, %s1685_s21), 127  ;;  %s2356_s15 = smov (!%p293_p5, %s1945_s15), 1 }
   0xf   : > { %s1686_s26 = sshll.u32 %s2354_s21, 2  ;;  %s1688_s14 = sshll.u32 %s2354_s21, 3 }
  0x10   : > { %s2016_s29 = scalar_lea.vmem %s2344_s0, %s1686_s26  ;;  %1776 = vmatpush3.bf16.msra.mxu0 %v1893_v2  ;;  %1861 = vmatpush3.bf16.msra.mxu1 %v1893_v2  ;;  %s2069_s22 = scalar_lea.vmem %s2346_s2, %s1688_s14 }
  0x11   : > { %v1899_v4 = vld [vmem:[%s2016_s29] sm:$0xff]   ;;  %1777 = vmatprep.subr.bf16.mxu0 %v1894_v3  ;;  %1854 = vmatprep.subr.bf16.mxu1 %v1894_v3  ;;  %v1900_v10 = vld [vmem:[%s2016_s29 + $0x8] sm:$0xff]   ;;  %v1901_v11 = vld [vmem:[%s2016_s29 + $0x10] sm:$0xff]   ;;  %s298_s24 = scalar_lea.vmem %s2347_s3, %s2356_s15  ;;  %s304_s27 = scalar_lea.vmem %s2348_s4, %s2356_s15 }
  0x12   : > { %1787 = vmatprep.mubr.bf16.mxu0 %v1899_v4  ;;  %v1915_v9 = vld [vmem:[%s2016_s29 + $0x80] sm:$0xff]   ;;  %v1916_v12 = vld [vmem:[%s2016_s29 + $0x88] sm:$0xff]   ;;  %v1917_v13 = vld [vmem:[%s2016_s29 + $0x90] sm:$0xff]  }
  0x13   : > { %1819 = vmatprep.mubr.bf16.mxu1 %v1915_v9  ;;  %v1902_v14 = vld [vmem:[%s2016_s29 + $0x18] sm:$0xff]   ;;  %v1903_v15 = vld [vmem:[%s2016_s29 + $0x20] sm:$0xff]   ;;  %v1904_v18 = vld [vmem:[%s2016_s29 + $0x28] sm:$0xff]  }
  0x14   : > { %1778 = vmatpush3.bf16.msra.mxu0 %v1894_v3  ;;  %1862 = vmatpush3.bf16.msra.mxu1 %v1894_v3  ;;  %v1918_v16 = vld [vmem:[%s2016_s29 + $0x98] sm:$0xff]   ;;  %v1919_v17 = vld [vmem:[%s2016_s29 + $0xa0] sm:$0xff]   ;;  %v1920_v19 = vld [vmem:[%s2016_s29 + $0xa8] sm:$0xff]  }
  0x15   : > { %1779 = vmatprep.subr.bf16.mxu0 %v1895_v5  ;;  %1855 = vmatprep.subr.bf16.mxu1 %v1895_v5  ;;  %v1905_v20 = vld [vmem:[%s2016_s29 + $0x30] sm:$0xff]   ;;  %v1906_v22 = vld [vmem:[%s2016_s29 + $0x38] sm:$0xff]   ;;  %v1907_v24 = vld [vmem:[%s2016_s29 + $0x40] sm:$0xff]  }
  0x16   : > { %v1921_v21 = vld [vmem:[%s2016_s29 + $0xb0] sm:$0xff]   ;;  %v1922_v23 = vld [vmem:[%s2016_s29 + $0xb8] sm:$0xff]   ;;  %v1923_v25 = vld [vmem:[%s2016_s29 + $0xc0] sm:$0xff]  }
  0x17   : > { %v1908_v26 = vld [vmem:[%s2016_s29 + $0x48] sm:$0xff]   ;;  %v1909_v28 = vld [vmem:[%s2016_s29 + $0x50] sm:$0xff]   ;;  %v1910_v30 = vld [vmem:[%s2016_s29 + $0x58] sm:$0xff]  }
  0x18   : > { %1780 = vmatpush3.bf16.msra.mxu0 %v1895_v5  ;;  %1863 = vmatpush3.bf16.msra.mxu1 %v1895_v5  ;;  %v1924_v27 = vld [vmem:[%s2016_s29 + $0xc8] sm:$0xff]   ;;  %v1925_v29 = vld [vmem:[%s2016_s29 + $0xd0] sm:$0xff]   ;;  %v1926_v31 = vld [vmem:[%s2016_s29 + $0xd8] sm:$0xff]  }
  0x19   : > { %1781 = vmatprep.subr.bf16.mxu0 %v1896_v6  ;;  %1856 = vmatprep.subr.bf16.mxu1 %v1896_v6  ;;  %v1911_v32 = vld [vmem:[%s2016_s29 + $0x60] sm:$0xff]   ;;  %v1912_v34 = vld [vmem:[%s2016_s29 + $0x68] sm:$0xff]   ;;  %v1913_v36 = vld [vmem:[%s2016_s29 + $0x70] sm:$0xff]  }
  0x1a   : > { %v1927_v33 = vld [vmem:[%s2016_s29 + $0xe0] sm:$0xff]   ;;  %v1928_v35 = vld [vmem:[%s2016_s29 + $0xe8] sm:$0xff]   ;;  %v1929_v37 = vld [vmem:[%s2016_s29 + $0xf0] sm:$0xff]  }
  0x1b   : > { %v1914_v38 = vld [vmem:[%s2016_s29 + $0x78] sm:$0xff]  }
  0x1c   : > { %1782 = vmatpush3.bf16.msra.mxu0 %v1896_v6  ;;  %1864 = vmatpush3.bf16.msra.mxu1 %v1896_v6  ;;  %v1930_v39 = vld [vmem:[%s2016_s29 + $0xf8] sm:$0xff]  }
  0x1d   : > { %1783 = vmatprep.subr.bf16.mxu0 %v1897_v7  ;;  %1857 = vmatprep.subr.bf16.mxu1 %v1897_v7 }
  0x20   : > { %1784 = vmatpush3.bf16.msra.mxu0 %v1897_v7  ;;  %1865 = vmatpush3.bf16.msra.mxu1 %v1897_v7 }
  0x21   : > { %1785 = vmatprep.subr.bf16.mxu0 %v1898_v8  ;;  %1858 = vmatprep.subr.bf16.mxu1 %v1898_v8 }
  0x24   : > { %1786 = vmatpush3.bf16.msra.mxu0 %v1898_v8  ;;  %1866 = vmatpush3.bf16.msra.mxu1 %v1898_v8 }
  0x27   : > { %1788 = vmatmul.mubr.bf16.vlgmr.msra.gmra.mrb[0].mxu0 %v1900_v10  ;;  %1820 = vmatmul.mubr.bf16.vlgmr.msra.gmra.mrb[0].mxu1 %v1916_v12 }
  0x28   : > { %1791 = vmatprep.mubr.bf16.mxu0 %v1901_v11  ;;  %1823 = vmatprep.mubr.bf16.mxu1 %v1917_v13 }
  0x2f   : > { %1792 = vmatmul.mubr.bf16.gmra.mrb[4].mxu0 %v1902_v14  ;;  %1824 = vmatmul.mubr.bf16.gmra.mrb[4].mxu1 %v1918_v16 }
  0x30   : > { %1795 = vmatprep.mubr.bf16.mxu0 %v1903_v15  ;;  %1827 = vmatprep.mubr.bf16.mxu1 %v1919_v17 }
  0x37   : > { %1796 = vmatmul.mubr.bf16.gmra.mrb[8].mxu0 %v1904_v18  ;;  %1828 = vmatmul.mubr.bf16.gmra.mrb[8].mxu1 %v1920_v19 }
  0x38   : > { %1799 = vmatprep.mubr.bf16.mxu0 %v1905_v20  ;;  %1831 = vmatprep.mubr.bf16.mxu1 %v1921_v21 }
  0x3f   : > { %1800 = vmatmul.mubr.bf16.gmra.mrb[12].mxu0 %v1906_v22  ;;  %1832 = vmatmul.mubr.bf16.gmra.mrb[12].mxu1 %v1922_v23 }
  0x40   : > { %1803 = vmatprep.mubr.bf16.mxu0 %v1907_v24  ;;  %1835 = vmatprep.mubr.bf16.mxu1 %v1923_v25 }
  0x47   : > { %1804 = vmatmul.mubr.bf16.gmra.mrb[16].mxu0 %v1908_v26  ;;  %1836 = vmatmul.mubr.bf16.gmra.mrb[16].mxu1 %v1924_v27 }
  0x48   : > { %1807 = vmatprep.mubr.bf16.mxu0 %v1909_v28  ;;  %1839 = vmatprep.mubr.bf16.mxu1 %v1925_v29 }
  0x4f   : > { %1808 = vmatmul.mubr.bf16.gmra.mrb[20].mxu0 %v1910_v30  ;;  %1840 = vmatmul.mubr.bf16.gmra.mrb[20].mxu1 %v1926_v31 }
  0x50   : > { %1811 = vmatprep.mubr.bf16.mxu0 %v1911_v32  ;;  %1843 = vmatprep.mubr.bf16.mxu1 %v1927_v33 }
  0x57   : > { %1812 = vmatmul.mubr.bf16.gmra.mrb[24].mxu0 %v1912_v34  ;;  %1844 = vmatmul.mubr.bf16.gmra.mrb[24].mxu1 %v1928_v35 }
  0x58   : > { %1815 = vmatprep.mubr.bf16.mxu0 %v1913_v36  ;;  %1847 = vmatprep.mubr.bf16.mxu1 %v1929_v37 }
  0x5f   : > { %1816 = vmatmul.mubr.bf16.gmra.mrb[28].mxu0 %v1914_v38  ;;  %1848 = vmatmul.mubr.bf16.gmra.mrb[28].mxu1 %v1930_v39 }
  0xfa   : > { %v1789_v40 = vpop.f32.mrb[0].mxu0  ;;  %v2071_v41 = vpop.f32.mrb[0].mxu1 }
  0xfb   : > { %1244 = vst [vmem:[%s2069_s22 + $0x10] sm:$0xff] %v1789_v40  ;;  %v792_v42 = vpop.f32.mrb[1].mxu0  ;;  %1276 = vst [vmem:[%s2069_s22 + $0x110] sm:$0xff] %v2071_v41  ;;  %v2076_v43 = vpop.f32.mrb[1].mxu1  ;;  %v1378_v51 = vmul.f32 %v1789_v40, %v1789_v40 }
  0xfc   : > { %1242 = vst [vmem:[%s2069_s22] sm:$0xff] %v792_v42  ;;  %v1790_v44 = vpop.f32.mrb[2].mxu0  ;;  %1274 = vst [vmem:[%s2069_s22 + $0x100] sm:$0xff] %v2076_v43  ;;  %v2081_v45 = vpop.f32.mrb[2].mxu1  ;;  %v1376_v48 = vmul.f32 %v792_v42, %v792_v42 }
  0xfd   : > { %1245 = vst [vmem:[%s2069_s22 + $0x18] sm:$0xff] %v1790_v44  ;;  %v795_v46 = vpop.f32.mrb[3].mxu0  ;;  %1277 = vst [vmem:[%s2069_s22 + $0x118] sm:$0xff] %v2081_v45  ;;  %v2086_v47 = vpop.f32.mrb[3].mxu1  ;;  %v1379_v54 = vmul.f32 %v1790_v44, %v1790_v44 }
  0xfe   : > { %1243 = vst [vmem:[%s2069_s22 + $0x8] sm:$0xff] %v795_v46  ;;  %v1306_v49 = vadd.f32 %v795_v46, %v792_v42  ;;  %v1377_v50 = vmul.f32 %v795_v46, %v795_v46  ;;  %1275 = vst [vmem:[%s2069_s22 + $0x108] sm:$0xff] %v2086_v47 }
 0x100   : > { %v1307_v52 = vadd.f32 %v1789_v40, %v1306_v49  ;;  %v1440_v53 = vadd.f32 %v1377_v50, %v1376_v48 }
 0x102   : > { %v1441_v55 = vadd.f32 %v1440_v53, %v1378_v51  ;;  %v1793_v56 = vpop.f32.mrb[4].mxu0  ;;  %v1308_v57 = vadd.f32 %v1790_v44, %v1307_v52  ;;  %v2091_v58 = vpop.f32.mrb[4].mxu1 }
 0x103   : > { %1248 = vst [vmem:[%s2069_s22 + $0x30] sm:$0xff] %v1793_v56  ;;  %v808_v59 = vpop.f32.mrb[5].mxu0  ;;  %1280 = vst [vmem:[%s2069_s22 + $0x130] sm:$0xff] %v2091_v58  ;;  %v2096_v60 = vpop.f32.mrb[5].mxu1  ;;  %v1382_v7 = vmul.f32 %v1793_v56, %v1793_v56 }
 0x104   : > { %1246 = vst [vmem:[%s2069_s22 + $0x20] sm:$0xff] %v808_v59  ;;  %v1309_v61 = vadd.f32 %v1308_v57, %v808_v59  ;;  %v1380_v62 = vmul.f32 %v808_v59, %v808_v59  ;;  %v1442_v63 = vadd.f32 %v1441_v55, %v1379_v54  ;;  %v1794_v0 = vpop.f32.mrb[6].mxu0  ;;  %1278 = vst [vmem:[%s2069_s22 + $0x120] sm:$0xff] %v2096_v60  ;;  %v2101_v1 = vpop.f32.mrb[6].mxu1 }
 0x105   : > { %1249 = vst [vmem:[%s2069_s22 + $0x38] sm:$0xff] %v1794_v0  ;;  %v811_v2 = vpop.f32.mrb[7].mxu0  ;;  %1281 = vst [vmem:[%s2069_s22 + $0x138] sm:$0xff] %v2101_v1  ;;  %v2106_v3 = vpop.f32.mrb[7].mxu1  ;;  %v1383_v10 = vmul.f32 %v1794_v0, %v1794_v0 }
 0x106   : > { %v1443_v4 = vadd.f32 %v1442_v63, %v1380_v62  ;;  %1247 = vst [vmem:[%s2069_s22 + $0x28] sm:$0xff] %v811_v2  ;;  %v1310_v5 = vadd.f32 %v1309_v61, %v811_v2  ;;  %v1381_v6 = vmul.f32 %v811_v2, %v811_v2  ;;  %1279 = vst [vmem:[%s2069_s22 + $0x128] sm:$0xff] %v2106_v3 }
 0x108   : > { %v1311_v8 = vadd.f32 %v1793_v56, %v1310_v5  ;;  %v1444_v9 = vadd.f32 %v1443_v4, %v1381_v6 }
 0x10a   : > { %v1445_v11 = vadd.f32 %v1444_v9, %v1382_v7  ;;  %v1797_v12 = vpop.f32.mrb[8].mxu0  ;;  %v1312_v13 = vadd.f32 %v1794_v0, %v1311_v8  ;;  %v2111_v14 = vpop.f32.mrb[8].mxu1 }
 0x10b   : > { %1252 = vst [vmem:[%s2069_s22 + $0x50] sm:$0xff] %v1797_v12  ;;  %v824_v15 = vpop.f32.mrb[9].mxu0  ;;  %1284 = vst [vmem:[%s2069_s22 + $0x150] sm:$0xff] %v2111_v14  ;;  %v2116_v16 = vpop.f32.mrb[9].mxu1  ;;  %v1386_v27 = vmul.f32 %v1797_v12, %v1797_v12 }
 0x10c   : > { %1250 = vst [vmem:[%s2069_s22 + $0x40] sm:$0xff] %v824_v15  ;;  %v1313_v17 = vadd.f32 %v1312_v13, %v824_v15  ;;  %v1384_v18 = vmul.f32 %v824_v15, %v824_v15  ;;  %v1446_v19 = vadd.f32 %v1445_v11, %v1383_v10  ;;  %v1798_v20 = vpop.f32.mrb[10].mxu0  ;;  %1282 = vst [vmem:[%s2069_s22 + $0x140] sm:$0xff] %v2116_v16  ;;  %v2121_v21 = vpop.f32.mrb[10].mxu1 }
 0x10d   : > { %1253 = vst [vmem:[%s2069_s22 + $0x58] sm:$0xff] %v1798_v20  ;;  %v827_v22 = vpop.f32.mrb[11].mxu0  ;;  %1285 = vst [vmem:[%s2069_s22 + $0x158] sm:$0xff] %v2121_v21  ;;  %v2126_v23 = vpop.f32.mrb[11].mxu1  ;;  %v1387_v30 = vmul.f32 %v1798_v20, %v1798_v20 }
 0x10e   : > { %v1447_v24 = vadd.f32 %v1446_v19, %v1384_v18  ;;  %1251 = vst [vmem:[%s2069_s22 + $0x48] sm:$0xff] %v827_v22  ;;  %v1314_v25 = vadd.f32 %v1313_v17, %v827_v22  ;;  %v1385_v26 = vmul.f32 %v827_v22, %v827_v22  ;;  %1283 = vst [vmem:[%s2069_s22 + $0x148] sm:$0xff] %v2126_v23 }
 0x110   : > { %v1315_v28 = vadd.f32 %v1797_v12, %v1314_v25  ;;  %v1448_v29 = vadd.f32 %v1447_v24, %v1385_v26 }
 0x112   : > { %v1449_v31 = vadd.f32 %v1448_v29, %v1386_v27  ;;  %v1801_v32 = vpop.f32.mrb[12].mxu0  ;;  %v1316_v33 = vadd.f32 %v1798_v20, %v1315_v28  ;;  %v2131_v34 = vpop.f32.mrb[12].mxu1 }
 0x113   : > { %1256 = vst [vmem:[%s2069_s22 + $0x70] sm:$0xff] %v1801_v32  ;;  %v840_v35 = vpop.f32.mrb[13].mxu0  ;;  %1288 = vst [vmem:[%s2069_s22 + $0x170] sm:$0xff] %v2131_v34  ;;  %v2136_v36 = vpop.f32.mrb[13].mxu1  ;;  %v1390_v51 = vmul.f32 %v1801_v32, %v1801_v32 }
 0x114   : > { %1254 = vst [vmem:[%s2069_s22 + $0x60] sm:$0xff] %v840_v35  ;;  %v1317_v37 = vadd.f32 %v1316_v33, %v840_v35  ;;  %v1388_v38 = vmul.f32 %v840_v35, %v840_v35  ;;  %v1450_v39 = vadd.f32 %v1449_v31, %v1387_v30  ;;  %v1802_v40 = vpop.f32.mrb[14].mxu0  ;;  %1286 = vst [vmem:[%s2069_s22 + $0x160] sm:$0xff] %v2136_v36  ;;  %v2141_v42 = vpop.f32.mrb[14].mxu1 }
 0x115   : > { %1257 = vst [vmem:[%s2069_s22 + $0x78] sm:$0xff] %v1802_v40  ;;  %v843_v44 = vpop.f32.mrb[15].mxu0  ;;  %1289 = vst [vmem:[%s2069_s22 + $0x178] sm:$0xff] %v2141_v42  ;;  %v2146_v46 = vpop.f32.mrb[15].mxu1  ;;  %v1391_v54 = vmul.f32 %v1802_v40, %v1802_v40 }
 0x116   : > { %v1451_v48 = vadd.f32 %v1450_v39, %v1388_v38  ;;  %1255 = vst [vmem:[%s2069_s22 + $0x68] sm:$0xff] %v843_v44  ;;  %v1318_v49 = vadd.f32 %v1317_v37, %v843_v44  ;;  %v1389_v50 = vmul.f32 %v843_v44, %v843_v44  ;;  %1287 = vst [vmem:[%s2069_s22 + $0x168] sm:$0xff] %v2146_v46 }
 0x118   : > { %v1319_v52 = vadd.f32 %v1801_v32, %v1318_v49  ;;  %v1452_v53 = vadd.f32 %v1451_v48, %v1389_v50 }
 0x11a   : > { %v1453_v55 = vadd.f32 %v1452_v53, %v1390_v51  ;;  %v1805_v56 = vpop.f32.mrb[16].mxu0  ;;  %v1320_v57 = vadd.f32 %v1802_v40, %v1319_v52  ;;  %v2151_v59 = vpop.f32.mrb[16].mxu1 }
 0x11b   : > { %1260 = vst [vmem:[%s2069_s22 + $0x90] sm:$0xff] %v1805_v56  ;;  %v856_v61 = vpop.f32.mrb[17].mxu0  ;;  %1292 = vst [vmem:[%s2069_s22 + $0x190] sm:$0xff] %v2151_v59  ;;  %v2156_v62 = vpop.f32.mrb[17].mxu1  ;;  %v1394_v11 = vmul.f32 %v1805_v56, %v1805_v56 }
 0x11c   : > { %1258 = vst [vmem:[%s2069_s22 + $0x80] sm:$0xff] %v856_v61  ;;  %v1321_v63 = vadd.f32 %v1320_v57, %v856_v61  ;;  %v1392_v0 = vmul.f32 %v856_v61, %v856_v61  ;;  %v1454_v2 = vadd.f32 %v1453_v55, %v1391_v54  ;;  %v1806_v4 = vpop.f32.mrb[18].mxu0  ;;  %1290 = vst [vmem:[%s2069_s22 + $0x180] sm:$0xff] %v2156_v62  ;;  %v2161_v5 = vpop.f32.mrb[18].mxu1 }
 0x11d   : > { %1261 = vst [vmem:[%s2069_s22 + $0x98] sm:$0xff] %v1806_v4  ;;  %v859_v6 = vpop.f32.mrb[19].mxu0  ;;  %1293 = vst [vmem:[%s2069_s22 + $0x198] sm:$0xff] %v2161_v5  ;;  %v2166_v7 = vpop.f32.mrb[19].mxu1  ;;  %v1395_v15 = vmul.f32 %v1806_v4, %v1806_v4 }
 0x11e   : > { %v1455_v8 = vadd.f32 %v1454_v2, %v1392_v0  ;;  %1259 = vst [vmem:[%s2069_s22 + $0x88] sm:$0xff] %v859_v6  ;;  %v1322_v9 = vadd.f32 %v1321_v63, %v859_v6  ;;  %v1393_v10 = vmul.f32 %v859_v6, %v859_v6  ;;  %1291 = vst [vmem:[%s2069_s22 + $0x188] sm:$0xff] %v2166_v7 }
 0x120   : > { %v1323_v12 = vadd.f32 %v1805_v56, %v1322_v9  ;;  %v1456_v13 = vadd.f32 %v1455_v8, %v1393_v10 }
 0x122   : > { %v1457_v17 = vadd.f32 %v1456_v13, %v1394_v11  ;;  %v1809_v18 = vpop.f32.mrb[20].mxu0  ;;  %v1324_v19 = vadd.f32 %v1806_v4, %v1323_v12  ;;  %v2171_v20 = vpop.f32.mrb[20].mxu1 }
 0x123   : > { %1264 = vst [vmem:[%s2069_s22 + $0xb0] sm:$0xff] %v1809_v18  ;;  %v872_v22 = vpop.f32.mrb[21].mxu0  ;;  %1296 = vst [vmem:[%s2069_s22 + $0x1b0] sm:$0xff] %v2171_v20  ;;  %v2176_v24 = vpop.f32.mrb[21].mxu1  ;;  %v1398_v37 = vmul.f32 %v1809_v18, %v1809_v18 }
 0x124   : > { %1262 = vst [vmem:[%s2069_s22 + $0xa0] sm:$0xff] %v872_v22  ;;  %v1325_v25 = vadd.f32 %v1324_v19, %v872_v22  ;;  %v1396_v26 = vmul.f32 %v872_v22, %v872_v22  ;;  %v1458_v27 = vadd.f32 %v1457_v17, %v1395_v15  ;;  %v1810_v28 = vpop.f32.mrb[22].mxu0  ;;  %1294 = vst [vmem:[%s2069_s22 + $0x1a0] sm:$0xff] %v2176_v24  ;;  %v2181_v29 = vpop.f32.mrb[22].mxu1 }
 0x125   : > { %1265 = vst [vmem:[%s2069_s22 + $0xb8] sm:$0xff] %v1810_v28  ;;  %v875_v30 = vpop.f32.mrb[23].mxu0  ;;  %1297 = vst [vmem:[%s2069_s22 + $0x1b8] sm:$0xff] %v2181_v29  ;;  %v2186_v31 = vpop.f32.mrb[23].mxu1  ;;  %v1399_v40 = vmul.f32 %v1810_v28, %v1810_v28 }
 0x126   : > { %v1459_v32 = vadd.f32 %v1458_v27, %v1396_v26  ;;  %1263 = vst [vmem:[%s2069_s22 + $0xa8] sm:$0xff] %v875_v30  ;;  %v1326_v33 = vadd.f32 %v1325_v25, %v875_v30  ;;  %v1397_v35 = vmul.f32 %v875_v30, %v875_v30  ;;  %1295 = vst [vmem:[%s2069_s22 + $0x1a8] sm:$0xff] %v2186_v31 }
 0x128   : > { %v1327_v38 = vadd.f32 %v1809_v18, %v1326_v33  ;;  %v1460_v39 = vadd.f32 %v1459_v32, %v1397_v35 }
 0x12a   : > { %v1461_v44 = vadd.f32 %v1460_v39, %v1398_v37  ;;  %v1813_v48 = vpop.f32.mrb[24].mxu0  ;;  %v1328_v49 = vadd.f32 %v1810_v28, %v1327_v38  ;;  %v2191_v50 = vpop.f32.mrb[24].mxu1 }
 0x12b   : > { %1268 = vst [vmem:[%s2069_s22 + $0xd0] sm:$0xff] %v1813_v48  ;;  %v888_v51 = vpop.f32.mrb[25].mxu0  ;;  %1300 = vst [vmem:[%s2069_s22 + $0x1d0] sm:$0xff] %v2191_v50  ;;  %v2196_v52 = vpop.f32.mrb[25].mxu1  ;;  %v1402_v6 = vmul.f32 %v1813_v48, %v1813_v48 }
 0x12c   : > { %1266 = vst [vmem:[%s2069_s22 + $0xc0] sm:$0xff] %v888_v51  ;;  %v1329_v53 = vadd.f32 %v1328_v49, %v888_v51  ;;  %v1400_v54 = vmul.f32 %v888_v51, %v888_v51  ;;  %v1462_v55 = vadd.f32 %v1461_v44, %v1399_v40  ;;  %v1814_v56 = vpop.f32.mrb[26].mxu0  ;;  %1298 = vst [vmem:[%s2069_s22 + $0x1c0] sm:$0xff] %v2196_v52  ;;  %v2201_v57 = vpop.f32.mrb[26].mxu1 }
 0x12d   : > { %1269 = vst [vmem:[%s2069_s22 + $0xd8] sm:$0xff] %v1814_v56  ;;  %v891_v61 = vpop.f32.mrb[27].mxu0  ;;  %1301 = vst [vmem:[%s2069_s22 + $0x1d8] sm:$0xff] %v2201_v57  ;;  %v2206_v63 = vpop.f32.mrb[27].mxu1  ;;  %v1403_v10 = vmul.f32 %v1814_v56, %v1814_v56  ;;  %v1408_v49 = vmul.f32 %v2076_v43, %v2076_v43 }
 0x12e   : > { %v1463_v0 = vadd.f32 %v1462_v55, %v1400_v54  ;;  %1267 = vst [vmem:[%s2069_s22 + $0xc8] sm:$0xff] %v891_v61  ;;  %v1330_v2 = vadd.f32 %v1329_v53, %v891_v61  ;;  %v1401_v4 = vmul.f32 %v891_v61, %v891_v61  ;;  %1299 = vst [vmem:[%s2069_s22 + $0x1c8] sm:$0xff] %v2206_v63 }
 0x12f   : > { %v1410_v61 = vmul.f32 %v2071_v41, %v2071_v41 }
 0x130   : > { %v1331_v8 = vadd.f32 %v1813_v48, %v1330_v2  ;;  %v1464_v9 = vadd.f32 %v1463_v0, %v1401_v4  ;;  %v1411_v4 = vmul.f32 %v2081_v45, %v2081_v45 }
 0x132   : > { %v1465_v11 = vadd.f32 %v1464_v9, %v1402_v6  ;;  %v1817_v12 = vpop.f32.mrb[28].mxu0  ;;  %v1332_v13 = vadd.f32 %v1814_v56, %v1331_v8  ;;  %v2211_v15 = vpop.f32.mrb[28].mxu1  ;;  %v1409_v56 = vmul.f32 %v2086_v47, %v2086_v47 }
 0x133   : > { %1272 = vst [vmem:[%s2069_s22 + $0xf0] sm:$0xff] %v1817_v12  ;;  %v904_v17 = vpop.f32.mrb[29].mxu0  ;;  %1304 = vst [vmem:[%s2069_s22 + $0x1f0] sm:$0xff] %v2211_v15  ;;  %v2216_v18 = vpop.f32.mrb[29].mxu1  ;;  %v1406_v37 = vmul.f32 %v1817_v12, %v1817_v12 }
 0x134   : > { %1270 = vst [vmem:[%s2069_s22 + $0xe0] sm:$0xff] %v904_v17  ;;  %v1333_v19 = vadd.f32 %v1332_v13, %v904_v17  ;;  %v1404_v22 = vmul.f32 %v904_v17, %v904_v17  ;;  %v1466_v25 = vadd.f32 %v1465_v11, %v1403_v10  ;;  %v1818_v26 = vpop.f32.mrb[30].mxu0  ;;  %1302 = vst [vmem:[%s2069_s22 + $0x1e0] sm:$0xff] %v2216_v18  ;;  %v2221_v27 = vpop.f32.mrb[30].mxu1 }
 0x135   : > { %1273 = vst [vmem:[%s2069_s22 + $0xf8] sm:$0xff] %v1818_v26  ;;  %v907_v28 = vpop.f32.mrb[31].mxu0  ;;  %1305 = vst [vmem:[%s2069_s22 + $0x1f8] sm:$0xff] %v2221_v27  ;;  %v2226_v30 = vpop.f32.mrb[31].mxu1  ;;  %v1407_v40 = vmul.f32 %v1818_v26, %v1818_v26 }
 0x136   : > { %v1467_v32 = vadd.f32 %v1466_v25, %v1404_v22  ;;  %1271 = vst [vmem:[%s2069_s22 + $0xe8] sm:$0xff] %v907_v28  ;;  %v1334_v33 = vadd.f32 %v1333_v19, %v907_v28  ;;  %v1405_v35 = vmul.f32 %v907_v28, %v907_v28  ;;  %1303 = vst [vmem:[%s2069_s22 + $0x1e8] sm:$0xff] %v2226_v30 }
 0x138   : > { %v1335_v38 = vadd.f32 %v1817_v12, %v1334_v33  ;;  %v1468_v39 = vadd.f32 %v1467_v32, %v1405_v35  ;;  %v1413_v12 = vmul.f32 %v2106_v3, %v2106_v3  ;;  %v1417_v32 = vmul.f32 %v2126_v23, %v2126_v23 }
 0x13a   : > { %v1469_v44 = vadd.f32 %v1468_v39, %v1406_v37  ;;  %v1336_v48 = vadd.f32 %v1818_v26, %v1335_v38 }
 0x13c   : > { %v1337_v51 = vadd.f32 %v1336_v48, %v2076_v43  ;;  %v1470_v53 = vadd.f32 %v1469_v44, %v1407_v40  ;;  %v1412_v43 = vmul.f32 %v2096_v60, %v2096_v60  ;;  %v1421_v48 = vmul.f32 %v2146_v46, %v2146_v46 }
 0x13e   : > { %v1471_v54 = vadd.f32 %v1470_v53, %v1408_v49  ;;  %v1338_v55 = vadd.f32 %v1337_v51, %v2086_v47 }
 0x140   : > { %v1339_v0 = vadd.f32 %v2071_v41, %v1338_v55  ;;  %v1472_v2 = vadd.f32 %v1471_v54, %v1409_v56  ;;  %v1414_v41 = vmul.f32 %v2091_v58, %v2091_v58 }
 0x142   : > { %v1473_v6 = vadd.f32 %v1472_v2, %v1410_v61  ;;  %v1340_v8 = vadd.f32 %v2081_v45, %v1339_v0  ;;  %v1415_v45 = vmul.f32 %v2101_v1, %v2101_v1  ;;  %v1425_v0 = vmul.f32 %v2166_v7, %v2166_v7 }
 0x144   : > { %v1341_v9 = vadd.f32 %v1340_v8, %v2096_v60  ;;  %v1474_v10 = vadd.f32 %v1473_v6, %v1411_v4  ;;  %v1416_v60 = vmul.f32 %v2116_v16, %v2116_v16 }
 0x146   : > { %v1475_v11 = vadd.f32 %v1474_v10, %v1412_v43  ;;  %v1342_v47 = vadd.f32 %v1341_v9, %v2106_v3 }
 0x148   : > { %v1343_v13 = vadd.f32 %v2091_v58, %v1342_v47  ;;  %v1476_v17 = vadd.f32 %v1475_v11, %v1413_v12  ;;  %v1418_v58 = vmul.f32 %v2111_v14, %v2111_v14  ;;  %v1429_v11 = vmul.f32 %v2186_v31, %v2186_v31 }
 0x14a   : > { %v1477_v19 = vadd.f32 %v1476_v17, %v1414_v41  ;;  %v1344_v22 = vadd.f32 %v2101_v1, %v1343_v13  ;;  %v1419_v1 = vmul.f32 %v2121_v21, %v2121_v21 }
 0x14c   : > { %v1345_v25 = vadd.f32 %v1344_v22, %v2116_v16  ;;  %v1478_v26 = vadd.f32 %v1477_v19, %v1415_v45  ;;  %v1420_v16 = vmul.f32 %v2136_v36, %v2136_v36  ;;  %v1433_v22 = vmul.f32 %v2206_v63, %v2206_v63 }
 0x14e   : > { %v1479_v28 = vadd.f32 %v1478_v26, %v1416_v60  ;;  %v1346_v3 = vadd.f32 %v1345_v25, %v2126_v23 }
 0x150   : > { %v1347_v33 = vadd.f32 %v2111_v14, %v1346_v3  ;;  %v1480_v35 = vadd.f32 %v1479_v28, %v1417_v32  ;;  %v1422_v14 = vmul.f32 %v2131_v34, %v2131_v34  ;;  %v1436_v28 = vmul.f32 %v2216_v18, %v2216_v18 }
 0x152   : > { %v1481_v37 = vadd.f32 %v1480_v35, %v1418_v58  ;;  %v1348_v38 = vadd.f32 %v2121_v21, %v1347_v33  ;;  %v1423_v21 = vmul.f32 %v2141_v42, %v2141_v42  ;;  %v1438_v33 = vmul.f32 %v2211_v15, %v2211_v15 }
 0x154   : > { %v1349_v39 = vadd.f32 %v1348_v38, %v2136_v36  ;;  %v1482_v40 = vadd.f32 %v1481_v37, %v1419_v1  ;;  %v1424_v36 = vmul.f32 %v2156_v62, %v2156_v62 }
 0x156   : > { %v1483_v44 = vadd.f32 %v1482_v40, %v1420_v16  ;;  %v1350_v23 = vadd.f32 %v1349_v39, %v2146_v46 }
 0x158   : > { %v1351_v49 = vadd.f32 %v2131_v34, %v1350_v23  ;;  %v1484_v51 = vadd.f32 %v1483_v44, %v1421_v48  ;;  %v1426_v34 = vmul.f32 %v2151_v59, %v2151_v59 }
 0x15a   : > { %v1485_v53 = vadd.f32 %v1484_v51, %v1422_v14  ;;  %v1352_v54 = vadd.f32 %v2141_v42, %v1351_v49  ;;  %v1427_v42 = vmul.f32 %v2161_v5, %v2161_v5 }
 0x15c   : > { %v1353_v55 = vadd.f32 %v1352_v54, %v2156_v62  ;;  %v1486_v56 = vadd.f32 %v1485_v53, %v1423_v21  ;;  %v1428_v62 = vmul.f32 %v2176_v24, %v2176_v24 }
 0x15e   : > { %v1487_v61 = vadd.f32 %v1486_v56, %v1424_v36  ;;  %v1354_v46 = vadd.f32 %v1353_v55, %v2166_v7 }
 0x160   : > { %v1355_v2 = vadd.f32 %v2151_v59, %v1354_v46  ;;  %v1488_v4 = vadd.f32 %v1487_v61, %v1425_v0  ;;  %v1430_v59 = vmul.f32 %v2171_v20, %v2171_v20 }
 0x162   : > { %v1489_v6 = vadd.f32 %v1488_v4, %v1426_v34  ;;  %v1356_v8 = vadd.f32 %v2161_v5, %v1355_v2  ;;  %v1431_v5 = vmul.f32 %v2181_v29, %v2181_v29 }
 0x164   : > { %v1357_v43 = vadd.f32 %v1356_v8, %v2176_v24  ;;  %v1490_v9 = vadd.f32 %v1489_v6, %v1427_v42  ;;  %v1432_v24 = vmul.f32 %v2196_v52, %v2196_v52 }
 0x166   : > { %v1491_v10 = vadd.f32 %v1490_v9, %v1428_v62  ;;  %v1358_v7 = vadd.f32 %v1357_v43, %v2186_v31 }
 0x168   : > { %v1359_v47 = vadd.f32 %v2171_v20, %v1358_v7  ;;  %v1492_v12 = vadd.f32 %v1491_v10, %v1429_v11  ;;  %v1434_v20 = vmul.f32 %v2191_v50, %v2191_v50 }
 0x16a   : > { %v1493_v41 = vadd.f32 %v1492_v12, %v1430_v59  ;;  %v1360_v13 = vadd.f32 %v2181_v29, %v1359_v47  ;;  %v1435_v29 = vmul.f32 %v2201_v57, %v2201_v57 }
 0x16c   : > { %v1361_v17 = vadd.f32 %v1360_v13, %v2196_v52  ;;  %v1494_v45 = vadd.f32 %v1493_v41, %v1431_v5 }
 0x16e   : > { %v1495_v19 = vadd.f32 %v1494_v45, %v1432_v24  ;;  %v1362_v31 = vadd.f32 %v1361_v17, %v2206_v63 }
 0x170   : > { %v1363_v60 = vadd.f32 %v2191_v50, %v1362_v31  ;;  %v1496_v25 = vadd.f32 %v1495_v19, %v1433_v22  ;;  %v1437_v50 = vmul.f32 %v2226_v30, %v2226_v30 }
 0x172   : > { %v1497_v26 = vadd.f32 %v1496_v25, %v1434_v20  ;;  %v1364_v52 = vadd.f32 %v2201_v57, %v1363_v60  ;;  %v1439_v57 = vmul.f32 %v2221_v27, %v2221_v27 }
 0x174   : > { %v1365_v3 = vadd.f32 %v1364_v52, %v2216_v18  ;;  %v1498_v32 = vadd.f32 %v1497_v26, %v1435_v29 }
 0x176   : > { %v1499_v63 = vadd.f32 %v1498_v32, %v1436_v28  ;;  %v1366_v58 = vadd.f32 %v1365_v3, %v2226_v30 }
 0x178   : > { %v1367_v35 = vadd.f32 %v2211_v15, %v1366_v58  ;;  %v1500_v1 = vadd.f32 %v1499_v63, %v1437_v50 }
 0x17a   : > { %v1368_v37 = vadd.f32 %v2221_v27, %v1367_v35  ;;  %v1501_v18 = vadd.f32 %v1500_v1, %v1438_v33 }
 0x17c   : > { %v1369_v38 = vrot.slane %v1368_v37, 4  ;;  %v1502_v16 = vadd.f32 %v1501_v18, %v1439_v57 }
 0x17e   : > { %v1370_v39 = vadd.f32 %v1369_v38, %v1368_v37  ;;  %v1503_v40 = vrot.slane %v1502_v16, 4 }
 0x180   : > { %v1371_v44 = vrot.slane %v1370_v39, 2  ;;  %v1504_v23 = vadd.f32 %v1503_v40, %v1502_v16 }
 0x182   : > { %v1372_v30 = vadd.f32 %v1371_v44, %v1370_v39  ;;  %v1505_v48 = vrot.slane %v1504_v23, 2 }
 0x184   : > { %v1373_v14 = vrot.slane %v1372_v30, 1  ;;  %v1506_v49 = vadd.f32 %v1505_v48, %v1504_v23 }
 0x186   : > { %v1374_v15 = vadd.f32 %v1373_v14, %v1372_v30  ;;  %v1507_v51 = vrot.slane %v1506_v49, 1 }
 0x188   : > { %1375 = vst [vmem:[%s298_s24] sm:$0x1] %v1374_v15  ;;  %v1508_v27 = vadd.f32 %v1507_v51, %v1506_v49 }
 0x18a   : > { %1509 = vst [vmem:[%s304_s27] sm:$0x1] %v1508_v27 }
 0x18b PF: > { %s15_s17 = sadd.s32 1, %s1953_s17   ;;  %s2349_s15 = smov %s1949_s16 }
 0x18c   : > { %p12_p6 = scmp.ge.s32.totalorder %s15_s17, 4   ;;  %s2350_s16 = smov %s2352_s18 }
 0x18e   :  { %14 = sbr.rel (!%p12_p6) target bundleno = 2 (0x2), region = 93 }

</bundles_post_ra>
